<compile_context>
chip_gen: v5e
topology: v5e:2x2
jax: 0.10.0
libtpu: 0.0.40
codegen_flags: <defaults>
</compile_context>

<pallas_src>
import functools

import jax
import jax.numpy as jnp
from jax.experimental import pallas as pl
from jax.experimental.pallas import tpu as pltpu


# ---------------------------------------------------------------------------
# Kernel 1: instance-tiled backbone.  For each (TILE_N, F) feature block:
#   mid   = relu(x @ w1)                          (DimReduction, VMEM only)
#   gated = tanh(mid @ wv + bv) * sigmoid(mid @ wu + bu)
#   aa    = ww . gated^T + bw                     raw attention logit (1, T)
#   base  = wc . mid^T                            CAM basis wc@mid_i  (C, T)
# bf16 MXU operands (weights pre-cast in the wrapper), f32 accumulation,
# f32 elementwise.  Instances land on the 128-lane axis of both outputs.
# ---------------------------------------------------------------------------
def _backbone_kernel(x_ref, w1_ref, wv_ref, bv_ref, wu_ref, bu_ref,
                     ww_ref, bw_ref, wc_ref, aa_ref, base_ref):
    # Note: production callers should store features in bf16 upstream to also
    # halve the HBM read; the in-kernel cast only buys MXU rate.
    x = x_ref[...].astype(jnp.bfloat16)
    mid = jnp.maximum(
        jnp.dot(x, w1_ref[...], preferred_element_type=jnp.float32), 0.0)
    mid_bf = mid.astype(jnp.bfloat16)

    a_v = jnp.tanh(
        jnp.dot(mid_bf, wv_ref[...], preferred_element_type=jnp.float32)
        + bv_ref[...])
    a_u = jax.nn.sigmoid(
        jnp.dot(mid_bf, wu_ref[...], preferred_element_type=jnp.float32)
        + bu_ref[...])
    gated = (a_v * a_u).astype(jnp.bfloat16)                       # (T, D)

    # Lane-dense NT matmuls (instances on the lane axis).
    aa = jnp.einsum('kd,nd->kn', ww_ref[...], gated,
                    preferred_element_type=jnp.float32) + bw_ref[...]
    base = jnp.einsum('cl,nl->cn', wc_ref[...], mid_bf,
                      preferred_element_type=jnp.float32)

    aa_ref[...] = aa
    base_ref[...] = base


def _run_backbone(tfeat, params, max_tile=512):
    N, F = tfeat.shape
    L = params["w1"].shape[1]
    D = params["wv"].shape[1]
    C = params["wc"].shape[0]

    # max_tile is a multiple of 256 (v6e/v7x MXU) and of 128 (v5e).  Small
    # bags collapse to a single full block (always BlockSpec-legal).
    tile = N if N <= max_tile else max_tile
    grid = (pl.cdiv(N, tile),)

    bf16 = jnp.bfloat16
    w1 = params["w1"].astype(bf16)
    wv = params["wv"].astype(bf16)
    wu = params["wu"].astype(bf16)
    ww = params["ww"].astype(bf16)
    wc = params["wc"].astype(bf16)

    def _tiled(i):
        return (i, 0)

    def _resident(i):
        return (0, 0)

    in_specs = [
        pl.BlockSpec((tile, F), _tiled),      # x tile (streamed)
        pl.BlockSpec((F, L), _resident),      # w1   (bf16, resident)
        pl.BlockSpec((L, D), _resident),      # wv
        pl.BlockSpec((1, D), _resident),      # bv   (f32)
        pl.BlockSpec((L, D), _resident),      # wu
        pl.BlockSpec((1, D), _resident),      # bu   (f32)
        pl.BlockSpec((1, D), _resident),      # ww
        pl.BlockSpec((1, 1), _resident),      # bw   (f32)
        pl.BlockSpec((C, L), _resident),      # wc
    ]
    out_specs = (
        pl.BlockSpec((1, tile), lambda i: (0, i)),
        pl.BlockSpec((C, tile), lambda i: (0, i)),
    )
    out_shape = (
        jax.ShapeDtypeStruct((1, N), jnp.float32),   # raw attention logits
        jax.ShapeDtypeStruct((C, N), jnp.float32),   # per-instance CAM basis
    )
    return pl.pallas_call(
        _backbone_kernel,
        grid=grid,
        in_specs=in_specs,
        out_specs=out_specs,
        out_shape=out_shape,
        compiler_params=pltpu.CompilerParams(
            dimension_semantics=("parallel",),
            vmem_limit_bytes=48 * 1024 * 1024),
    )(tfeat, w1, wv, params["bv"], wu, params["bu"], ww, params["bw"], wc)


# ---------------------------------------------------------------------------
# Kernel 2: tiny per-group tail (single block, O(G*C*n_per) work).
#   aa_grp   : (G, n)      attention logits, group-contiguous, instances=lanes
#   base_grp : (G, C, n)   wc @ mid_i, group-contiguous
#   bc       : (1, C)      classifier bias
# outputs:
#   pred     : (G, C)      per-group bag prediction  (== classifier(attFeat))
#   plast    : (G, n)      last-class CAM softmax probability per instance
# ---------------------------------------------------------------------------
def _group_tail_kernel(aa_ref, base_ref, bc_ref, pred_ref, plast_ref):
    lg = aa_ref[...]                                           # (G, n)
    a = jnp.exp(lg - jnp.max(lg, axis=-1, keepdims=True))
    a = a * pl.reciprocal(jnp.sum(a, axis=-1, keepdims=True), approx=True)

    base = base_ref[...]                                       # (G, C, n)
    cam = a[:, None, :] * base                                 # (G, C, n)

    # Bag prediction via linearity: sum_i a_i*(wc@mid_i) + bc.
    pred_ref[...] = (jnp.sum(cam, axis=-1) + bc_ref[...]).astype(pred_ref.dtype)

    n_cls = base.shape[1]
    if n_cls == 2:
        # 2-class CAM softmax of the last class == sigmoid(logit diff).
        plast = jax.nn.sigmoid(cam[:, 1, :] - cam[:, 0, :])
    else:
        mx = jnp.max(cam, axis=1, keepdims=True)
        e = jnp.exp(cam - mx)
        plast = e[:, n_cls - 1, :] * pl.reciprocal(jnp.sum(e, axis=1),
                                                   approx=True)
    plast_ref[...] = plast.astype(plast_ref.dtype)


def _run_group_tail(aa_grp, base_grp, bc):
    G, n_per = aa_grp.shape
    C = base_grp.shape[1]
    return pl.pallas_call(
        _group_tail_kernel,
        out_shape=(jax.ShapeDtypeStruct((G, C), jnp.float32),
                   jax.ShapeDtypeStruct((G, n_per), jnp.float32)),
    )(aa_grp, base_grp, bc)


# ---------------------------------------------------------------------------
# Kernel 3: exact-f32 DimReduction recompute for the few selected rows only
# (G*2*ipg rows), replacing the full (N, L) mid HBM writeback.
# ---------------------------------------------------------------------------
def _pseudo_feat_kernel(x_ref, w1_ref, o_ref):
    o_ref[...] = jnp.maximum(
        jnp.dot(x_ref[...], w1_ref[...], preferred_element_type=jnp.float32),
        0.0).astype(o_ref.dtype)


def _run_pseudo_feat(sel_x, w1):
    K, _ = sel_x.shape
    L = w1.shape[1]
    return pl.pallas_call(
        _pseudo_feat_kernel,
        out_shape=jax.ShapeDtypeStruct((K, L), jnp.float32),
    )(sel_x, w1)


# ---------------------------------------------------------------------------
# Full forward pass (mirrors DTFD_MIL_tier1.forward, distill='MaxMinS').
# `perm` is the host-supplied random instance shuffle (stand-in for
# random.shuffle + np.array_split); group g = instances perm[g*n_per:(g+1)*n_per].
# ---------------------------------------------------------------------------
def dtfd_tier1_forward(params, tfeat, tslide_label, perm,
                       num_group=3, total_instance=3, return_attn=True,
                       max_tile=512):
    N, _ = tfeat.shape
    assert N % num_group == 0, "example keeps groups equal-sized"
    n_per = N // num_group
    ipg = total_instance // num_group  # instance_per_group

    # Heavy pass: per-instance attention logits + CAM basis, original order.
    aa, base_t = _run_backbone(tfeat, params, max_tile=max_tile)
    C = base_t.shape[0]

    # Group gather on the tiny per-instance rows only (never on (N, F)).
    aa_grp = aa[0, perm].reshape(num_group, n_per)
    base_grp = base_t[:, perm].reshape(C, num_group, n_per).transpose(1, 0, 2)

    pred, plast = _run_group_tail(aa_grp, base_grp, params["bc"])

    # MaxMinS selection (data-dependent top/bottom-k; tiny glue).
    sort_idx = jnp.argsort(-plast, axis=1)                       # descending
    topk = jnp.concatenate(
        [sort_idx[:, :ipg], sort_idx[:, n_per - ipg:]], axis=1)  # (G, 2*ipg)
    rows_local = topk + (jnp.arange(num_group) * n_per)[:, None]
    rows_orig = perm[rows_local.reshape(-1)]                     # original ids
    sel_x = tfeat[rows_orig]                                     # (G*2*ipg, F)
    slide_pseudo_feat = _run_pseudo_feat(sel_x, params["w1"])

    slide_sub_labels = jnp.tile(tslide_label, num_group)

    # Raw attention is per-instance, so the backbone row IS the full-bag
    # attention (isNorm=False) already in original order.
    AA = aa if return_attn else jnp.zeros((1, 0), jnp.float32)

    return slide_pseudo_feat, pred, slide_sub_labels, AA


def init_params(key, fea_dim, n_classes, L=512, D=256):
    ks = jax.random.split(key, 6)
    s = 0.02
    return {
        # w1/wv/wu stored transposed (in_features, out_features) for x @ W.
        "w1": s * jax.random.normal(ks[0], (fea_dim, L), jnp.float32),
        "wv": s * jax.random.normal(ks[1], (L, D), jnp.float32),
        "bv": jnp.zeros((1, D), jnp.float32),
        "wu": s * jax.random.normal(ks[2], (L, D), jnp.float32),
        "bu": jnp.zeros((1, D), jnp.float32),
        # ww/wc kept in PyTorch (out_features, in_features) layout so the
        # kernel's NT dot_generals land instances on the lane axis.
        "ww": s * jax.random.normal(ks[3], (1, D), jnp.float32),
        "bw": jnp.zeros((1, 1), jnp.float32),
        "wc": s * jax.random.normal(ks[4], (n_classes, L), jnp.float32),
        "bc": jnp.zeros((1, n_classes), jnp.float32),
    }


if __name__ == "__main__":
    key = jax.random.PRNGKey(0)
    k_param, k_feat, k_perm, k_param2, k_feat2, k_perm2 = jax.random.split(key, 6)

    # --- Case 1: toy bag (single full block, grid=(1,)) ------------------
    N, FEA_DIM, N_CLASSES = 12, 128, 2
    NUM_GROUP, TOTAL_INSTANCE = 3, 3
    params = init_params(k_param, FEA_DIM, N_CLASSES)
    tfeat = jax.random.normal(k_feat, (N, FEA_DIM), jnp.float32)
    tslide_label = jnp.array([1], dtype=jnp.int32)
    perm = jax.random.permutation(k_perm, N)

    fwd = jax.jit(functools.partial(
        dtfd_tier1_forward,
        num_group=NUM_GROUP, total_instance=TOTAL_INSTANCE, return_attn=True))
    pseudo_feat, sub_preds, sub_labels, AA = fwd(
        params, tfeat, tslide_label, perm)
    jax.block_until_ready((pseudo_feat, sub_preds, sub_labels, AA))

    ipg = TOTAL_INSTANCE // NUM_GROUP
    assert pseudo_feat.shape == (NUM_GROUP * 2 * ipg, 512)
    assert sub_preds.shape == (NUM_GROUP, N_CLASSES)
    assert sub_labels.shape == (NUM_GROUP,)
    assert AA.shape == (1, N)

    # --- Case 2: exercises the instance-tiled grid path (grid=(2,)) ------
    N2, F2, G2, TI2 = 1024, 256, 4, 8
    params2 = init_params(k_param2, F2, N_CLASSES)
    tfeat2 = jax.random.normal(k_feat2, (N2, F2), jnp.float32)
    perm2 = jax.random.permutation(k_perm2, N2)

    fwd2 = jax.jit(functools.partial(
        dtfd_tier1_forward,
        num_group=G2, total_instance=TI2, return_attn=True))
    pf2, sp2, sl2, AA2 = fwd2(params2, tfeat2, tslide_label, perm2)
    jax.block_until_ready((pf2, sp2, sl2, AA2))

    ipg2 = TI2 // G2
    assert pf2.shape == (G2 * 2 * ipg2, 512)
    assert sp2.shape == (G2, N_CLASSES)
    assert sl2.shape == (G2,)
    assert AA2.shape == (1, N2)

    print("KERNEL_OK")
</pallas_src>

<mosaic_0001>
module attributes {stable_mosaic.version = 11 : i64} {
  func.func @_backbone_kernel(%arg0: i32, %arg1: memref<12x128xf32, #tpu.memory_space<vmem>>, %arg2: memref<128x512xbf16, #tpu.memory_space<vmem>>, %arg3: memref<512x256xbf16, #tpu.memory_space<vmem>>, %arg4: memref<1x256xf32, #tpu.memory_space<vmem>>, %arg5: memref<512x256xbf16, #tpu.memory_space<vmem>>, %arg6: memref<1x256xf32, #tpu.memory_space<vmem>>, %arg7: memref<1x256xbf16, #tpu.memory_space<vmem>>, %arg8: memref<1x1xf32, #tpu.memory_space<vmem>>, %arg9: memref<2x512xbf16, #tpu.memory_space<vmem>>, %arg10: memref<1x12xf32, #tpu.memory_space<vmem>>, %arg11: memref<2x12xf32, #tpu.memory_space<vmem>>) attributes {dimension_semantics = [#tpu.dimension_semantics<parallel>], iteration_bounds = array<i64: 1>, scalar_prefetch = 0 : i64, scratch_operands = 0 : i64, tpu.core_type = #tpu.core_type<tc>, window_params = [{transform_indices = @transform_0, window_bounds = array<i64: 12, 128>}, {pipeline_mode = #tpu.pipeline_mode<synchronous>, transform_indices = @transform_1, window_bounds = array<i64: 128, 512>}, {pipeline_mode = #tpu.pipeline_mode<synchronous>, transform_indices = @transform_2, window_bounds = array<i64: 512, 256>}, {pipeline_mode = #tpu.pipeline_mode<synchronous>, transform_indices = @transform_3, window_bounds = array<i64: 1, 256>}, {pipeline_mode = #tpu.pipeline_mode<synchronous>, transform_indices = @transform_4, window_bounds = array<i64: 512, 256>}, {pipeline_mode = #tpu.pipeline_mode<synchronous>, transform_indices = @transform_5, window_bounds = array<i64: 1, 256>}, {pipeline_mode = #tpu.pipeline_mode<synchronous>, transform_indices = @transform_6, window_bounds = array<i64: 1, 256>}, {pipeline_mode = #tpu.pipeline_mode<synchronous>, transform_indices = @transform_7, window_bounds = array<i64: 1, 1>}, {pipeline_mode = #tpu.pipeline_mode<synchronous>, transform_indices = @transform_8, window_bounds = array<i64: 2, 512>}, {transform_indices = @transform_9, window_bounds = array<i64: 1, 12>}, {transform_indices = @transform_10, window_bounds = array<i64: 2, 12>}]} {
    %c0 = arith.constant 0 : index
    %c0_0 = arith.constant 0 : index
    %0 = vector.load %arg1[%c0, %c0_0] : memref<12x128xf32, #tpu.memory_space<vmem>>, vector<12x128xf32>
    %1 = arith.truncf %0 : vector<12x128xf32> to vector<12x128xbf16>
    %c0_1 = arith.constant 0 : index
    %c0_2 = arith.constant 0 : index
    %2 = vector.load %arg2[%c0_1, %c0_2] : memref<128x512xbf16, #tpu.memory_space<vmem>>, vector<128x512xbf16>
    %cst = arith.constant dense<0.000000e+00> : vector<12x512xf32>
    %3 = tpu.matmul %1, %2, %cst {dimension_numbers = #tpu.dot_dimension_numbers<[1], [0], [0], [1], [0, 0, 1, 1], [], []>} : vector<12x128xbf16>, vector<128x512xbf16>, vector<12x512xf32> -> vector<12x512xf32>
    %cst_3 = arith.constant 0.000000e+00 : f32
    %4 = vector.broadcast %cst_3 : f32 to vector<12x512xf32>
    %5 = arith.maximumf %3, %4 : vector<12x512xf32>
    %6 = arith.truncf %5 : vector<12x512xf32> to vector<12x512xbf16>
    %c0_4 = arith.constant 0 : index
    %c0_5 = arith.constant 0 : index
    %7 = vector.load %arg3[%c0_4, %c0_5] : memref<512x256xbf16, #tpu.memory_space<vmem>>, vector<512x256xbf16>
    %cst_6 = arith.constant dense<0.000000e+00> : vector<12x256xf32>
    %8 = tpu.matmul %6, %7, %cst_6 {dimension_numbers = #tpu.dot_dimension_numbers<[1], [0], [0], [1], [0, 0, 1, 1], [], []>} : vector<12x512xbf16>, vector<512x256xbf16>, vector<12x256xf32> -> vector<12x256xf32>
    %c0_7 = arith.constant 0 : index
    %c0_8 = arith.constant 0 : index
    %9 = vector.load %arg4[%c0_7, %c0_8] : memref<1x256xf32, #tpu.memory_space<vmem>>, vector<1x256xf32>
    %10 = vector.broadcast %9 : vector<1x256xf32> to vector<12x256xf32>
    %11 = arith.addf %8, %10 : vector<12x256xf32>
    %12 = math.tanh %11 : vector<12x256xf32>
    %c0_9 = arith.constant 0 : index
    %c0_10 = arith.constant 0 : index
    %13 = vector.load %arg5[%c0_9, %c0_10] : memref<512x256xbf16, #tpu.memory_space<vmem>>, vector<512x256xbf16>
    %cst_11 = arith.constant dense<0.000000e+00> : vector<12x256xf32>
    %14 = tpu.matmul %6, %13, %cst_11 {dimension_numbers = #tpu.dot_dimension_numbers<[1], [0], [0], [1], [0, 0, 1, 1], [], []>} : vector<12x512xbf16>, vector<512x256xbf16>, vector<12x256xf32> -> vector<12x256xf32>
    %c0_12 = arith.constant 0 : index
    %c0_13 = arith.constant 0 : index
    %15 = vector.load %arg6[%c0_12, %c0_13] : memref<1x256xf32, #tpu.memory_space<vmem>>, vector<1x256xf32>
    %16 = vector.broadcast %15 : vector<1x256xf32> to vector<12x256xf32>
    %17 = arith.addf %14, %16 : vector<12x256xf32>
    %18 = arith.negf %17 : vector<12x256xf32>
    %19 = math.exp %18 : vector<12x256xf32>
    %cst_14 = arith.constant 1.000000e+00 : f32
    %20 = vector.broadcast %cst_14 : f32 to vector<12x256xf32>
    %21 = arith.addf %20, %19 : vector<12x256xf32>
    %22 = arith.divf %20, %21 : vector<12x256xf32>
    %23 = arith.mulf %12, %22 : vector<12x256xf32>
    %24 = arith.truncf %23 : vector<12x256xf32> to vector<12x256xbf16>
    %c0_15 = arith.constant 0 : index
    %c0_16 = arith.constant 0 : index
    %25 = vector.load %arg7[%c0_15, %c0_16] : memref<1x256xbf16, #tpu.memory_space<vmem>>, vector<1x256xbf16>
    "tpu.trace_start"() <{level = 10 : i32, message = "kd,nd->kn"}> : () -> ()
    %cst_17 = arith.constant dense<0.000000e+00> : vector<1x12xf32>
    %26 = tpu.matmul %25, %24, %cst_17 {dimension_numbers = #tpu.dot_dimension_numbers<[1], [1], [0], [0], [0, 0, 1, 0], [], []>} : vector<1x256xbf16>, vector<12x256xbf16>, vector<1x12xf32> -> vector<1x12xf32>
    "tpu.trace_stop"() : () -> ()
    %c0_18 = arith.constant 0 : index
    %c0_19 = arith.constant 0 : index
    %27 = vector.load %arg8[%c0_18, %c0_19] : memref<1x1xf32, #tpu.memory_space<vmem>>, vector<1x1xf32>
    %28 = vector.broadcast %27 : vector<1x1xf32> to vector<1x12xf32>
    %29 = arith.addf %26, %28 : vector<1x12xf32>
    %c0_20 = arith.constant 0 : index
    %c0_21 = arith.constant 0 : index
    %30 = vector.load %arg9[%c0_20, %c0_21] : memref<2x512xbf16, #tpu.memory_space<vmem>>, vector<2x512xbf16>
    "tpu.trace_start"() <{level = 10 : i32, message = "cl,nl->cn"}> : () -> ()
    %cst_22 = arith.constant dense<0.000000e+00> : vector<2x12xf32>
    %31 = tpu.matmul %30, %6, %cst_22 {dimension_numbers = #tpu.dot_dimension_numbers<[1], [1], [0], [0], [0, 0, 1, 0], [], []>} : vector<2x512xbf16>, vector<12x512xbf16>, vector<2x12xf32> -> vector<2x12xf32>
    "tpu.trace_stop"() : () -> ()
    %c0_23 = arith.constant 0 : index
    %c0_24 = arith.constant 0 : index
    %32 = vector.load %arg10[%c0_23, %c0_24] : memref<1x12xf32, #tpu.memory_space<vmem>>, vector<1x12xf32>
    tpu.vector_store %arg10[%c0_23, %c0_24], %29 {strides = array<i32>} : memref<1x12xf32, #tpu.memory_space<vmem>>, vector<1x12xf32>,
    %c0_25 = arith.constant 0 : index
    %c0_26 = arith.constant 0 : index
    %33 = vector.load %arg11[%c0_25, %c0_26] : memref<2x12xf32, #tpu.memory_space<vmem>>, vector<2x12xf32>
    tpu.vector_store %arg11[%c0_25, %c0_26], %31 {strides = array<i32>} : memref<2x12xf32, #tpu.memory_space<vmem>>, vector<2x12xf32>,
    return
  }
  func.func @transform_0(%arg0: i32) -> (i32, i32) {
    %c0_i32 = arith.constant 0 : i32
    %c0_i32_0 = arith.constant 0 : i32
    return %arg0, %c0_i32 : i32, i32
  }
  func.func @transform_1(%arg0: i32) -> (i32, i32) {
    %c0_i32 = arith.constant 0 : i32
    %c0_i32_0 = arith.constant 0 : i32
    %c0_i32_1 = arith.constant 0 : i32
    return %c0_i32, %c0_i32_0 : i32, i32
  }
  func.func @transform_2(%arg0: i32) -> (i32, i32) {
    %c0_i32 = arith.constant 0 : i32
    %c0_i32_0 = arith.constant 0 : i32
    %c0_i32_1 = arith.constant 0 : i32
    return %c0_i32, %c0_i32_0 : i32, i32
  }
  func.func @transform_3(%arg0: i32) -> (i32, i32) {
    %c0_i32 = arith.constant 0 : i32
    %c0_i32_0 = arith.constant 0 : i32
    %c0_i32_1 = arith.constant 0 : i32
    return %c0_i32, %c0_i32_0 : i32, i32
  }
  func.func @transform_4(%arg0: i32) -> (i32, i32) {
    %c0_i32 = arith.constant 0 : i32
    %c0_i32_0 = arith.constant 0 : i32
    %c0_i32_1 = arith.constant 0 : i32
    return %c0_i32, %c0_i32_0 : i32, i32
  }
  func.func @transform_5(%arg0: i32) -> (i32, i32) {
    %c0_i32 = arith.constant 0 : i32
    %c0_i32_0 = arith.constant 0 : i32
    %c0_i32_1 = arith.constant 0 : i32
    return %c0_i32, %c0_i32_0 : i32, i32
  }
  func.func @transform_6(%arg0: i32) -> (i32, i32) {
    %c0_i32 = arith.constant 0 : i32
    %c0_i32_0 = arith.constant 0 : i32
    %c0_i32_1 = arith.constant 0 : i32
    return %c0_i32, %c0_i32_0 : i32, i32
  }
  func.func @transform_7(%arg0: i32) -> (i32, i32) {
    %c0_i32 = arith.constant 0 : i32
    %c0_i32_0 = arith.constant 0 : i32
    %c0_i32_1 = arith.constant 0 : i32
    return %c0_i32, %c0_i32_0 : i32, i32
  }
  func.func @transform_8(%arg0: i32) -> (i32, i32) {
    %c0_i32 = arith.constant 0 : i32
    %c0_i32_0 = arith.constant 0 : i32
    %c0_i32_1 = arith.constant 0 : i32
    return %c0_i32, %c0_i32_0 : i32, i32
  }
  func.func @transform_9(%arg0: i32) -> (i32, i32) {
    %c0_i32 = arith.constant 0 : i32
    %c0_i32_0 = arith.constant 0 : i32
    return %c0_i32, %arg0 : i32, i32
  }
  func.func @transform_10(%arg0: i32) -> (i32, i32) {
    %c0_i32 = arith.constant 0 : i32
    %c0_i32_0 = arith.constant 0 : i32
    return %c0_i32, %arg0 : i32, i32
  }
}

module attributes {stable_mosaic.version = 11 : i64} {
  func.func @_group_tail_kernel(%arg0: memref<3x4xf32, #tpu.memory_space<vmem>>, %arg1: memref<3x2x4xf32, #tpu.memory_space<vmem>>, %arg2: memref<1x2xf32, #tpu.memory_space<vmem>>, %arg3: memref<3x2xf32, #tpu.memory_space<vmem>>, %arg4: memref<3x4xf32, #tpu.memory_space<vmem>>) attributes {dimension_semantics = [], scalar_prefetch = 0 : i64, scratch_operands = 0 : i64, tpu.core_type = #tpu.core_type<tc>} {
    %c0 = arith.constant 0 : index
    %c0_0 = arith.constant 0 : index
    %0 = vector.load %arg0[%c0, %c0_0] : memref<3x4xf32, #tpu.memory_space<vmem>>, vector<3x4xf32>
    %cst = arith.constant dense<0xFF800000> : vector<3xf32>
    %1 = vector.multi_reduction <maximumf>, %0, %cst [1] : vector<3x4xf32> to vector<3xf32>
    %2 = vector.shape_cast %1 : vector<3xf32> to vector<3x1xf32>
    %3 = vector.broadcast %2 : vector<3x1xf32> to vector<3x4xf32>
    %4 = arith.subf %0, %3 : vector<3x4xf32>
    %5 = math.exp %4 : vector<3x4xf32>
    %cst_1 = arith.constant dense<0.000000e+00> : vector<3xf32>
    %6 = vector.multi_reduction <add>, %5, %cst_1 [1] : vector<3x4xf32> to vector<3xf32>
    %7 = vector.shape_cast %6 : vector<3xf32> to vector<3x1xf32>
    %8 = tpu.reciprocal %7 {approx = true} : vector<3x1xf32> -> vector<3x1xf32>
    %9 = vector.broadcast %8 : vector<3x1xf32> to vector<3x4xf32>
    %10 = arith.mulf %5, %9 : vector<3x4xf32>
    %c0_2 = arith.constant 0 : index
    %c0_3 = arith.constant 0 : index
    %c0_4 = arith.constant 0 : index
    %11 = vector.load %arg1[%c0_2, %c0_3, %c0_4] : memref<3x2x4xf32, #tpu.memory_space<vmem>>, vector<3x2x4xf32>
    %12 = vector.shape_cast %10 : vector<3x4xf32> to vector<3x1x4xf32>
    %13 = vector.broadcast %12 : vector<3x1x4xf32> to vector<3x2x4xf32>
    %14 = arith.mulf %13, %11 : vector<3x2x4xf32>
    %cst_5 = arith.constant dense<0.000000e+00> : vector<3x2xf32>
    %15 = vector.multi_reduction <add>, %14, %cst_5 [2] : vector<3x2x4xf32> to vector<3x2xf32>
    %c0_6 = arith.constant 0 : index
    %c0_7 = arith.constant 0 : index
    %16 = vector.load %arg2[%c0_6, %c0_7] : memref<1x2xf32, #tpu.memory_space<vmem>>, vector<1x2xf32>
    %17 = vector.broadcast %16 : vector<1x2xf32> to vector<3x2xf32>
    %18 = arith.addf %15, %17 : vector<3x2xf32>
    %c0_8 = arith.constant 0 : index
    %c0_9 = arith.constant 0 : index
    %19 = vector.load %arg3[%c0_8, %c0_9] : memref<3x2xf32, #tpu.memory_space<vmem>>, vector<3x2xf32>
    tpu.vector_store %arg3[%c0_8, %c0_9], %18 {strides = array<i32>} : memref<3x2xf32, #tpu.memory_space<vmem>>, vector<3x2xf32>,
    %20 = vector.extract_strided_slice %14 {offsets = [0, 1, 0], sizes = [3, 1, 4], strides = [1, 1, 1]} : vector<3x2x4xf32> to vector<3x1x4xf32>
    %21 = vector.shape_cast %20 : vector<3x1x4xf32> to vector<3x4xf32>
    %22 = vector.extract_strided_slice %14 {offsets = [0, 0, 0], sizes = [3, 1, 4], strides = [1, 1, 1]} : vector<3x2x4xf32> to vector<3x1x4xf32>
    %23 = vector.shape_cast %22 : vector<3x1x4xf32> to vector<3x4xf32>
    %24 = arith.subf %21, %23 : vector<3x4xf32>
    %25 = arith.negf %24 : vector<3x4xf32>
    %26 = math.exp %25 : vector<3x4xf32>
    %cst_10 = arith.constant 1.000000e+00 : f32
    %27 = vector.broadcast %cst_10 : f32 to vector<3x4xf32>
    %28 = arith.addf %27, %26 : vector<3x4xf32>
    %29 = arith.divf %27, %28 : vector<3x4xf32>
    %c0_11 = arith.constant 0 : index
    %c0_12 = arith.constant 0 : index
    %30 = vector.load %arg4[%c0_11, %c0_12] : memref<3x4xf32, #tpu.memory_space<vmem>>, vector<3x4xf32>
    tpu.vector_store %arg4[%c0_11, %c0_12], %29 {strides = array<i32>} : memref<3x4xf32, #tpu.memory_space<vmem>>, vector<3x4xf32>,
    return
  }
}

module attributes {stable_mosaic.version = 11 : i64} {
  func.func @_pseudo_feat_kernel(%arg0: memref<6x128xf32, #tpu.memory_space<vmem>>, %arg1: memref<128x512xf32, #tpu.memory_space<vmem>>, %arg2: memref<6x512xf32, #tpu.memory_space<vmem>>) attributes {dimension_semantics = [], scalar_prefetch = 0 : i64, scratch_operands = 0 : i64, tpu.core_type = #tpu.core_type<tc>} {
    %c0 = arith.constant 0 : index
    %c0_0 = arith.constant 0 : index
    %0 = vector.load %arg0[%c0, %c0_0] : memref<6x128xf32, #tpu.memory_space<vmem>>, vector<6x128xf32>
    %c0_1 = arith.constant 0 : index
    %c0_2 = arith.constant 0 : index
    %1 = vector.load %arg1[%c0_1, %c0_2] : memref<128x512xf32, #tpu.memory_space<vmem>>, vector<128x512xf32>
    %cst = arith.constant dense<0.000000e+00> : vector<6x512xf32>
    %2 = tpu.matmul %0, %1, %cst {dimension_numbers = #tpu.dot_dimension_numbers<[1], [0], [0], [1], [0, 0, 1, 1], [], []>} : vector<6x128xf32>, vector<128x512xf32>, vector<6x512xf32> -> vector<6x512xf32>
    %cst_3 = arith.constant 0.000000e+00 : f32
    %3 = vector.broadcast %cst_3 : f32 to vector<6x512xf32>
    %4 = arith.maximumf %2, %3 : vector<6x512xf32>
    %c0_4 = arith.constant 0 : index
    %c0_5 = arith.constant 0 : index
    %5 = vector.load %arg2[%c0_4, %c0_5] : memref<6x512xf32, #tpu.memory_space<vmem>>, vector<6x512xf32>
    tpu.vector_store %arg2[%c0_4, %c0_5], %4 {strides = array<i32>} : memref<6x512xf32, #tpu.memory_space<vmem>>, vector<6x512xf32>,
    return
  }
}

</mosaic_0001>

<bundles_post_ra>
// kernel: neg.1
= control target key start
LH: loop header
LB: loop body
LE: loop exit
PB: predicated region body
PF: predicated region fallthrough
CT: control target
= control target key end

     0   :  { %s24_s0 = inlined_call_operand.vmem [shape: f32[3,4], index: 0, kind: input, shape index: {}]   ;;  %s25_s1 = inlined_call_operand.vmem [shape: f32[3,4], index: 1, kind: output, shape index: {}]  }
   0x1   :  { %v2_v0 = vld [vmem:[%s24_s0] sm:$0x7] }
   0x2   :  { %v5_v1 = vxor.u32 2147483648, %v2_v0 }
   0x4   :  { %7 = vst [vmem:[%s25_s1] sm:$0xf] %v5_v1 }

// kernel: dtfd_tier1_forward.4
= control target key start
LH: loop header
LB: loop body
LE: loop exit
PB: predicated region body
PF: predicated region fallthrough
CT: control target
= control target key end

     0   :  { %vm17_vm0 = vcmask 26624   ;;  %v57_v9 = vlaneseq  ;;  %vm44_vm1 = vcmask 25600   ;;  %vm86_vm13 = vcmask 1042434   ;;  %s264_s0 = inlined_call_operand.vmem [shape: f32[3,4], index: 0, kind: input, shape index: {}]   ;;  %s265_s2 = inlined_call_operand.vmem [shape: f32[1,2], index: 2, kind: input, shape index: {}]   ;;  %s266_s1 = inlined_call_operand.vmem [shape: f32[3,2,4], index: 1, kind: input, shape index: {}]   ;;  %s267_s4 = inlined_call_operand.vmem [shape: f32[3,4], index: 4, kind: output, shape index: {1}]   ;;  %s268_s3 = inlined_call_operand.vmem [shape: f32[3,2], index: 3, kind: output, shape index: {0}]  }
   0x1   :  { %v16_v0 = vld [vmem:[%s264_s0] sm:$0x7]  ;;  %v31_v16 = vld [vmem:[%s266_s1 + $0x4] sm:$0x3]  ;;  %vm166_vm15 = vcmask 1043459  }
   0x2   :  { %v18_v1 = vsel %vm17_vm0, %v16_v0, -inf  ;;  %v29_v11 = vld [vmem:[%s266_s1] sm:$0x3]  ;;  %v58_v12 = vshrl.u32 %v57_v9, 7  ;;  %v30_v17 = vld [vmem:[%s266_s1 + $0x2] sm:$0x3] }
   0x3   :  { %19 = vmax.xlane.f32.xlu0 %v18_v1  ;;  %v187_v44 = vld [vmem:[%s265_s2] ss:$0 sm:$0xff] }
   0x4   :  { %183 = vset.pattern.permute.xlu2 %v58_v12 }
  0x76   :  { %v20_v2 = vpop.xlane.xlu0 %19 }
  0x77   :  { %v21_v3 = vsub.f32 %v16_v0, %v20_v2 }
  0x79   :  { %v22_v4 = vmul.f32 1.442695, %v21_v3 }
  0x7b   :  { %188 = vpow2.f32 %v22_v4 }
  0x81   :  { %v189_v5 = vpop.eup %188 }
  0x82   :  { %v24_v6 = vsel %vm17_vm0, %v189_v5, 0.0  ;;  %vm169_vm0 = vcmask 27649  }
  0x83   :  { %25 = vadd.xlane.f32.xlu0 %v24_v6 }
  0xf6   :  { %v26_v7 = vpop.xlane.xlu0 %25 }
  0xf7   :  { %190 = vrcp.f32 %v26_v7 }
  0xfd   :  { %v191_v8 = vpop.eup %190 }
  0xfe   :  { %v28_v10 = vmul.f32 %v191_v8, %v189_v5 }
 0x100   :  { %v35_v13 = vperm.slane %v28_v10, 0  ;;  %v34_v14 = vrot.slane %v28_v10, 2  ;;  %v33_v15 = vrot.slane %v28_v10, 1 }
 0x102   :  { %v41_v18 = vmul.f32 %v35_v13, %v29_v11  ;;  %v37_v19 = vperm.slane %v34_v14, 0  ;;  %v36_v20 = vperm.slane %v33_v15, 0  ;;  %v204_v14 = vmov 0  }
 0x103   :  { %185 = vset.pattern.permute.xlu1 %v204_v14  ;;  %184 = vset.pattern.permute.xlu0 %v204_v14 }
 0x104   :  { %v45_v21 = vsel %vm44_vm1, %v41_v18, 0.0  ;;  %v94_v22 = vrot.slane %v41_v18, 7  ;;  %v43_v23 = vmul.f32 %v37_v19, %v31_v16  ;;  %v42_v24 = vmul.f32 %v36_v20, %v30_v17 }
 0x105   :  { %46 = vadd.xlane.f32.xlu1 %v45_v21 }
 0x106   :  { %v100_v25 = vsub.f32 %v41_v18, %v94_v22  ;;  %v51_v26 = vsel %vm44_vm1, %v43_v23, 0.0  ;;  %v96_v27 = vrot.slane %v43_v23, 7  ;;  %v95_v28 = vrot.slane %v42_v24, 7 }
 0x107   :  { %52 = vadd.xlane.f32.xlu2 %v51_v26  ;;  %v48_v34 = vsel %vm44_vm1, %v42_v24, 0.0  ;;  %v80_v22 = vand.u32 127, %v57_v9  ;;  %vm84_vm1 = vcmask 1041409  }
 0x108   :  { %v179_v29 = vmul.f32 -1.442695, %v100_v25  ;;  %v102_v30 = vsub.f32 %v43_v23, %v96_v27  ;;  %v101_v31 = vsub.f32 %v42_v24, %v95_v28 }
 0x10a   :  { %192 = vpow2.f32 %v179_v29  ;;  %v181_v32 = vmul.f32 -1.442695, %v102_v30  ;;  %v180_v33 = vmul.f32 -1.442695, %v101_v31 }
 0x10c   :  { %194 = vpow2.f32 %v181_v32 }
 0x10d   :  { %196 = vpow2.f32 %v180_v33  ;;  %49 = vadd.xlane.f32.xlu1 %v48_v34 }
 0x110   :  { %v193_v35 = vpop.eup %192 }
 0x111   :  { %v112_v36 = vadd.f32 1.0, %v193_v35 }
 0x112   :  { %v195_v37 = vpop.eup %194 }
 0x113   :  { %v197_v38 = vpop.eup %196  ;;  %198 = vrcp.f32 %v112_v36  ;;  %v114_v39 = vadd.f32 1.0, %v195_v37  ;;  %vm120_vm2 = vweird.f32 %v112_v36  ;;  %v126_v60 = vand.u32 2147483648, %v112_v36 }
 0x114   :  { %v113_v40 = vadd.f32 1.0, %v197_v38  ;;  %v124_v62 = vand.u32 2147483647, %v112_v36 }
 0x115   :  { %200 = vrcp.f32 %v114_v39  ;;  %v156_v52 = vand.u32 2147483648, %v114_v39  ;;  %v154_v55 = vand.u32 2147483647, %v114_v39  ;;  %vm150_vm6 = vweird.f32 %v114_v39 }
 0x116   :  { %202 = vrcp.f32 %v113_v40  ;;  %v141_v54 = vand.u32 2147483648, %v113_v40  ;;  %v139_v58 = vand.u32 2147483647, %v113_v40  ;;  %vm135_vm8 = vweird.f32 %v113_v40 }
 0x117   :  { %v157_v0 = vor.u32 1.1754944e-38, %v156_v52  ;;  %vm155_vm11 = vcmp.eq.f32.partialorder %v154_v55, 8.507059e+37  ;;  %v127_v6 = vor.u32 1.1754944e-38, %v126_v60  ;;  %vm125_vm14 = vcmp.eq.f32.partialorder %v124_v62, 8.507059e+37 }
 0x118   :  { %v142_v1 = vor.u32 1.1754944e-38, %v141_v54  ;;  %vm140_vm12 = vcmp.eq.f32.partialorder %v139_v58, 8.507059e+37 }
 0x119   :  { %v199_v41 = vpop.eup %198 }
 0x11a   :  { %v116_v42 = vmul.f32 %v199_v41, %v112_v36  ;;  %vm121_vm3 = vweird.f32 %v199_v41 }
 0x11b   :  { %v201_v43 = vpop.eup %200  ;;  %vm249_vm7 = vmor %vm120_vm2, %vm121_vm3  ;;  %vm89_vm2 = vcmask 10240  }
 0x11c   :  { %v203_v45 = vpop.eup %202  ;;  %v117_v46 = vsub.f32 1.0, %v116_v42  ;;  %v146_v47 = vmul.f32 %v201_v43, %v114_v39  ;;  %vm151_vm4 = vweird.f32 %v201_v43 }
 0x11d   :  { %v131_v48 = vmul.f32 %v203_v45, %v113_v40  ;;  %vm136_vm5 = vweird.f32 %v203_v45  ;;  %vm152_vm9 = vmor %vm150_vm6, %vm151_vm4 }
 0x11e   :  { %v147_v49 = vsub.f32 1.0, %v146_v47  ;;  %v118_v50 = vmul.f32 %v199_v41, %v117_v46  ;;  %vm137_vm10 = vmor %vm135_vm8, %vm136_vm5 }
 0x11f   :  { %v132_v51 = vsub.f32 1.0, %v131_v48  ;;  %61 = vperm.xlu2 %183, %v187_v44  }
 0x120   :  { %v148_v53 = vmul.f32 %v201_v43, %v147_v49  ;;  %v119_v56 = vadd.f32 %v199_v41, %v118_v50 }
 0x121   :  { %v133_v57 = vmul.f32 %v203_v45, %v132_v51 }
 0x122   :  { %v149_v61 = vadd.f32 %v201_v43, %v148_v53  ;;  %v123_v3 = vsel %vm249_vm7, %v199_v41, %v119_v56 }
 0x123   :  { %v134_v63 = vadd.f32 %v203_v45, %v133_v57  ;;  %v128_v11 = vsel %vm125_vm14, %v127_v6, %v123_v3 }
 0x124   :  { %v153_v2 = vsel %vm152_vm9, %v201_v43, %v149_v61 }
 0x125   :  { %v138_v4 = vsel %vm137_vm10, %v203_v45, %v134_v63  ;;  %v158_v5 = vsel %vm155_vm11, %v157_v0, %v153_v2 }
 0x126   :  { %v143_v7 = vsel %vm140_vm12, %v142_v1, %v138_v4  ;;  %v165_v8 = vrot.slane %v158_v5, 6 }
 0x127   :  { %v163_v10 = vrot.slane %v143_v7, 7  ;;  %186 = vset.pattern.permute.xlu2 %v204_v14 }
 0x129   :  { %v164_v12 = vsel %vm86_vm13, %v163_v10, %v128_v11 }
 0x12a   :  { %v167_v13 = vsel %vm166_vm15, %v165_v8, %v164_v12 }
 0x12b   :  { %170 = vst.msk [vmem:[%s267_s4 - $0x1] sm:$0xe] %vm169_vm0, %v167_v13 }
 0x178   :  { %v47_v15 = vpop.xlane.xlu1 %46 }
 0x17a   :  { %v53_v16 = vpop.xlane.xlu2 %52 }
 0x180   :  { %v50_v17 = vpop.xlane.xlu1 %49 }
 0x182   :  { %v62_v18 = vpop.permute.xlu2 %61 }
 0x183   :  { %v64_v19 = vadd.f32 %v62_v18, %v47_v15  ;;  %v65_v20 = vadd.f32 %v62_v18, %v50_v17  ;;  %v66_v21 = vadd.f32 %v62_v18, %v53_v16 }
 0x185   :  { %77 = vperm.xlu2 %186, %v66_v21   ;;  %71 = vperm.xlu0 %184, %v64_v19  }
 0x186   :  { %74 = vperm.xlu1 %185, %v65_v20  }
 0x1df   :  { %v78_v23 = vpop.permute.xlu2 %77 }
 0x1e0   :  { %v83_v28 = vperm.slane %v78_v23, %v80_v22 }
 0x1f7   :  { %v72_v24 = vpop.permute.xlu0 %71 }
 0x1f8   :  { %v81_v25 = vperm.slane %v72_v24, %v80_v22  ;;  %v75_v26 = vpop.permute.xlu1 %74 }
 0x1f9   :  { %v82_v27 = vperm.slane %v75_v26, %v80_v22 }
 0x1fb   :  { %v85_v29 = vsel %vm84_vm1, %v82_v27, %v81_v25 }
 0x1fc   :  { %v87_v30 = vsel %vm86_vm13, %v83_v28, %v85_v29 }
 0x1fd   :  { %90 = vst.msk [vmem:[%s268_s3] sm:$0x7] %vm89_vm2, %v87_v30 }

// kernel: dtfd_tier1_forward.3
= control target key start
LH: loop header
LB: loop body
LE: loop exit
PB: predicated region body
PF: predicated region fallthrough
CT: control target
= control target key end

     0   :  { %s3418_s1 = inlined_call_operand.vmem [shape: bf16[128,512], index: 1, kind: input, shape index: {}]   ;;  %s3419_s0 = inlined_call_operand.vmem [shape: f32[12,128], index: 0, kind: input, shape index: {}]   ;;  %s3420_s2 = inlined_call_operand.vmem [shape: bf16[512,256], index: 2, kind: input, shape index: {}]   ;;  %s3421_s4 = inlined_call_operand.vmem [shape: bf16[512,256], index: 4, kind: input, shape index: {}]   ;;  %s3422_s3 = inlined_call_operand.vmem [shape: f32[1,256], index: 3, kind: input, shape index: {}]   ;;  %s3423_s5 = inlined_call_operand.vmem [shape: f32[1,256], index: 5, kind: input, shape index: {}]   ;;  %s3424_s6 = inlined_call_operand.vmem [shape: bf16[1,256], index: 6, kind: input, shape index: {}]   ;;  %s3425_s8 = inlined_call_operand.vmem [shape: bf16[2,512], index: 8, kind: input, shape index: {}]   ;;  %s3426_s7 = inlined_call_operand.<no memory space> [shape: f32[1,1], index: 7, kind: input, shape index: {}]   ;;  %s3427_s9 = inlined_call_operand.vmem [shape: f32[1,12], index: 9, kind: output, shape index: {0}]   ;;  %s3428_s10 = inlined_call_operand.vmem [shape: f32[2,12], index: 10, kind: output, shape index: {1}]  }
   0x1   :  { %v1619_v0 = vld [vmem:[%s3418_s1 + $0xe0] sm:$0xf]  ;;  %v2179_v1 = vld [vmem:[%s3418_s1 + $0xec] sm:$0xf0]  ;;  %v2177_v2 = vld [vmem:[%s3418_s1 + $0xe4] sm:$0xf] }
   0x2   :  { %v1620_v3 = vor.u32 %v2179_v1, %v1619_v0  ;;  %v1621_v4 = vld [vmem:[%s3418_s1 + $0xf0] sm:$0xf0]  ;;  %v1627_v5 = vld [vmem:[%s3418_s1 + $0xe8] sm:$0xf]  ;;  %v2180_v6 = vld [vmem:[%s3418_s1 + $0xf4] sm:$0xf0] }
   0x3   :  { %v1624_v7 = vor.u32 %v2177_v2, %v1621_v4  ;;  %v1628_v8 = vor.u32 %v2180_v6, %v1627_v5  ;;  %v2178_v9 = vld [vmem:[%s3418_s1 + $0xec] sm:$0xf]  ;;  %v1629_v10 = vld [vmem:[%s3418_s1 + $0xf8] sm:$0xf0]  ;;  %v1603_v11 = vld [vmem:[%s3418_s1 + $0xc0] sm:$0xf] }
   0x4   :  { %232 = vmatpush.bf16.msra.mxu0 %v1620_v3  ;;  %v1632_v12 = vor.u32 %v2178_v9, %v1629_v10  ;;  %v2175_v13 = vld [vmem:[%s3418_s1 + $0xcc] sm:$0xf0]  ;;  %v2173_v14 = vld [vmem:[%s3418_s1 + $0xc4] sm:$0xf]  ;;  %v1605_v15 = vld [vmem:[%s3418_s1 + $0xd0] sm:$0xf0] }
   0x5   :  { %246 = vmatpush.bf16.msra.mxu1 %v1624_v7  ;;  %260 = vmatpush.bf16.msra.mxu2 %v1628_v8  ;;  %v1604_v16 = vor.u32 %v2175_v13, %v1603_v11  ;;  %v1608_v17 = vor.u32 %v2173_v14, %v1605_v15  ;;  %v1611_v18 = vld [vmem:[%s3418_s1 + $0xc8] sm:$0xf]  ;;  %v2176_v19 = vld [vmem:[%s3418_s1 + $0xd4] sm:$0xf0]  ;;  %v2174_v20 = vld [vmem:[%s3418_s1 + $0xcc] sm:$0xf] }
   0x6   :  { %274 = vmatpush.bf16.msra.mxu3 %v1632_v12  ;;  %v1612_v21 = vor.u32 %v2176_v19, %v1611_v18  ;;  %v1613_v22 = vld [vmem:[%s3418_s1 + $0xd8] sm:$0xf0]  ;;  %v1587_v23 = vld [vmem:[%s3418_s1 + $0xa0] sm:$0xf]  ;;  %v2171_v24 = vld [vmem:[%s3418_s1 + $0xac] sm:$0xf0] }
   0x7   :  { %v1616_v25 = vor.u32 %v2174_v20, %v1613_v22  ;;  %v2169_v26 = vld [vmem:[%s3418_s1 + $0xa4] sm:$0xf]  ;;  %v1589_v27 = vld [vmem:[%s3418_s1 + $0xb0] sm:$0xf0]  ;;  %v1595_v28 = vld [vmem:[%s3418_s1 + $0xa8] sm:$0xf]  ;;  %v1588_v29 = vor.u32 %v2171_v24, %v1587_v23 }
   0x8   :  { %233 = vmatpush.bf16.msra.mxu0 %v1604_v16  ;;  %v2172_v30 = vld [vmem:[%s3418_s1 + $0xb4] sm:$0xf0]  ;;  %v2170_v31 = vld [vmem:[%s3418_s1 + $0xac] sm:$0xf]  ;;  %v1597_v32 = vld [vmem:[%s3418_s1 + $0xb8] sm:$0xf0]  ;;  %v1592_v33 = vor.u32 %v2169_v26, %v1589_v27 }
   0x9   :  { %247 = vmatpush.bf16.msra.mxu1 %v1608_v17  ;;  %261 = vmatpush.bf16.msra.mxu2 %v1612_v21  ;;  %v1596_v34 = vor.u32 %v2172_v30, %v1595_v28  ;;  %v1571_v35 = vld [vmem:[%s3418_s1 + $0x80] sm:$0xf]  ;;  %v2167_v36 = vld [vmem:[%s3418_s1 + $0x8c] sm:$0xf0]  ;;  %v2165_v37 = vld [vmem:[%s3418_s1 + $0x84] sm:$0xf]  ;;  %v1600_v38 = vor.u32 %v2170_v31, %v1597_v32 }
   0xa   :  { %275 = vmatpush.bf16.msra.mxu3 %v1616_v25  ;;  %v1573_v39 = vld [vmem:[%s3418_s1 + $0x90] sm:$0xf0]  ;;  %v1579_v40 = vld [vmem:[%s3418_s1 + $0x88] sm:$0xf]  ;;  %v2168_v41 = vld [vmem:[%s3418_s1 + $0x94] sm:$0xf0]  ;;  %v1572_v44 = vor.u32 %v2167_v36, %v1571_v35 }
   0xb   :  { %v2166_v42 = vld [vmem:[%s3418_s1 + $0x8c] sm:$0xf]  ;;  %v1581_v43 = vld [vmem:[%s3418_s1 + $0x98] sm:$0xf0]  ;;  %v1576_v45 = vor.u32 %v2165_v37, %v1573_v39  ;;  %v1580_v46 = vor.u32 %v2168_v41, %v1579_v40  ;;  %v1555_v47 = vld [vmem:[%s3418_s1 + $0x60] sm:$0xf] }
   0xc   :  { %234 = vmatpush.bf16.msra.mxu0 %v1588_v29  ;;  %v2163_v48 = vld [vmem:[%s3418_s1 + $0x6c] sm:$0xf0]  ;;  %v2161_v49 = vld [vmem:[%s3418_s1 + $0x64] sm:$0xf]  ;;  %v1584_v50 = vor.u32 %v2166_v42, %v1581_v43  ;;  %v1557_v51 = vld [vmem:[%s3418_s1 + $0x70] sm:$0xf0] }
   0xd   :  { %248 = vmatpush.bf16.msra.mxu1 %v1592_v33  ;;  %262 = vmatpush.bf16.msra.mxu2 %v1596_v34  ;;  %v1563_v52 = vld [vmem:[%s3418_s1 + $0x68] sm:$0xf]  ;;  %v2164_v53 = vld [vmem:[%s3418_s1 + $0x74] sm:$0xf0]  ;;  %v2162_v54 = vld [vmem:[%s3418_s1 + $0x6c] sm:$0xf]  ;;  %v1556_v56 = vor.u32 %v2163_v48, %v1555_v47  ;;  %v1560_v57 = vor.u32 %v2161_v49, %v1557_v51 }
   0xe   :  { %276 = vmatpush.bf16.msra.mxu3 %v1600_v38  ;;  %v1565_v55 = vld [vmem:[%s3418_s1 + $0x78] sm:$0xf0]  ;;  %v1564_v58 = vor.u32 %v2164_v53, %v1563_v52  ;;  %v1539_v59 = vld [vmem:[%s3418_s1 + $0x40] sm:$0xf]  ;;  %v2159_v60 = vld [vmem:[%s3418_s1 + $0x4c] sm:$0xf0] }
   0xf   :  { %v2157_v61 = vld [vmem:[%s3418_s1 + $0x44] sm:$0xf]  ;;  %v1568_v62 = vor.u32 %v2162_v54, %v1565_v55  ;;  %v1541_v63 = vld [vmem:[%s3418_s1 + $0x50] sm:$0xf0]  ;;  %v1547_v0 = vld [vmem:[%s3418_s1 + $0x48] sm:$0xf]  ;;  %v1540_v4 = vor.u32 %v2159_v60, %v1539_v59 }
  0x10   :  { %235 = vmatpush.bf16.msra.mxu0 %v1572_v44  ;;  %v2160_v1 = vld [vmem:[%s3418_s1 + $0x54] sm:$0xf0]  ;;  %v2158_v2 = vld [vmem:[%s3418_s1 + $0x4c] sm:$0xf]  ;;  %v1549_v3 = vld [vmem:[%s3418_s1 + $0x58] sm:$0xf0]  ;;  %v1544_v5 = vor.u32 %v2157_v61, %v1541_v63 }
  0x11   :  { %249 = vmatpush.bf16.msra.mxu1 %v1576_v45  ;;  %263 = vmatpush.bf16.msra.mxu2 %v1580_v46  ;;  %v1548_v6 = vor.u32 %v2160_v1, %v1547_v0  ;;  %v1523_v7 = vld [vmem:[%s3418_s1 + $0x20] sm:$0xf]  ;;  %v2155_v8 = vld [vmem:[%s3418_s1 + $0x2c] sm:$0xf0]  ;;  %v2153_v9 = vld [vmem:[%s3418_s1 + $0x24] sm:$0xf]  ;;  %v1552_v10 = vor.u32 %v2158_v2, %v1549_v3 }
  0x12   :  { %277 = vmatpush.bf16.msra.mxu3 %v1584_v50  ;;  %v1525_v11 = vld [vmem:[%s3418_s1 + $0x30] sm:$0xf0]  ;;  %v1531_v12 = vld [vmem:[%s3418_s1 + $0x28] sm:$0xf]  ;;  %v2156_v13 = vld [vmem:[%s3418_s1 + $0x34] sm:$0xf0]  ;;  %v1524_v16 = vor.u32 %v2155_v8, %v1523_v7 }
  0x13   :  { %v2154_v14 = vld [vmem:[%s3418_s1 + $0x2c] sm:$0xf]  ;;  %v1533_v15 = vld [vmem:[%s3418_s1 + $0x38] sm:$0xf0]  ;;  %v1507_v17 = vld [vmem:[%s3418_s1] sm:$0xf]  ;;  %v1528_v19 = vor.u32 %v2153_v9, %v1525_v11  ;;  %v1532_v20 = vor.u32 %v2156_v13, %v1531_v12 }
  0x14   :  { %236 = vmatpush.bf16.msra.mxu0 %v1556_v56  ;;  %v2151_v18 = vld [vmem:[%s3418_s1 + $0xc] sm:$0xf0]  ;;  %v2149_v21 = vld [vmem:[%s3418_s1 + $0x4] sm:$0xf]  ;;  %v1509_v22 = vld [vmem:[%s3418_s1 + $0x10] sm:$0xf0]  ;;  %v1536_v24 = vor.u32 %v2154_v14, %v1533_v15 }
  0x15   :  { %250 = vmatpush.bf16.msra.mxu1 %v1560_v57  ;;  %264 = vmatpush.bf16.msra.mxu2 %v1564_v58  ;;  %v1515_v23 = vld [vmem:[%s3418_s1 + $0x8] sm:$0xf]  ;;  %v2152_v25 = vld [vmem:[%s3418_s1 + $0x14] sm:$0xf0]  ;;  %v2150_v26 = vld [vmem:[%s3418_s1 + $0xc] sm:$0xf]  ;;  %v1508_v31 = vor.u32 %v2151_v18, %v1507_v17  ;;  %v1512_v35 = vor.u32 %v2149_v21, %v1509_v22 }
  0x16   :  { %278 = vmatpush.bf16.msra.mxu3 %v1568_v62  ;;  %v1517_v27 = vld [vmem:[%s3418_s1 + $0x18] sm:$0xf0]  ;;  %v37_v28 = vld [vmem:[%s3419_s0] sm:$0xff]  ;;  %v1691_v29 = vld [vmem:[%s3420_s2 + $0x70] sm:$0xf]  ;;  %v1516_v36 = vor.u32 %v2152_v25, %v1515_v23 }
  0x17   :  { %v2196_v30 = vld [vmem:[%s3420_s2 + $0x74] sm:$0xf0]  ;;  %v38_v32 = vld [vmem:[%s3419_s0 + $0x8] sm:$0xf]  ;;  %v1755_v33 = vld [vmem:[%s3420_s2 + $0xf0] sm:$0xf]  ;;  %v1520_v37 = vor.u32 %v2150_v26, %v1517_v27 }
  0x18   :  { %237 = vmatpush.bf16.msra.mxu0 %v1540_v4  ;;  %v2212_v34 = vld [vmem:[%s3420_s2 + $0xf4] sm:$0xf0]  ;;  %v1692_v38 = vor.u32 %v2196_v30, %v1691_v29  ;;  %v1683_v39 = vld [vmem:[%s3420_s2 + $0x60] sm:$0xf]  ;;  %v1819_v40 = vld [vmem:[%s3420_s2 + $0x170] sm:$0xf]  ;;  %v39_v42 = vpack.c.bf16 %v38_v32, %v37_v28 }
  0x19   :  { %251 = vmatpush.bf16.msra.mxu1 %v1544_v5  ;;  %265 = vmatpush.bf16.msra.mxu2 %v1548_v6  ;;  %v2228_v41 = vld [vmem:[%s3420_s2 + $0x174] sm:$0xf0]  ;;  %v1756_v43 = vor.u32 %v2212_v34, %v1755_v33  ;;  %v2194_v44 = vld [vmem:[%s3420_s2 + $0x64] sm:$0xf0]  ;;  %v1883_v45 = vld [vmem:[%s3420_s2 + $0x1f0] sm:$0xf] }
  0x1a   :  { %279 = vmatpush.bf16.msra.mxu3 %v1552_v10  ;;  %v2244_v46 = vld [vmem:[%s3420_s2 + $0x1f4] sm:$0xf0]  ;;  %v1747_v47 = vld [vmem:[%s3420_s2 + $0xe0] sm:$0xf]  ;;  %v2210_v48 = vld [vmem:[%s3420_s2 + $0xe4] sm:$0xf0]  ;;  %v1820_v49 = vor.u32 %v2228_v41, %v1819_v40  ;;  %v1684_v50 = vor.u32 %v2194_v44, %v1683_v39 }
  0x1b   :  { %v1884_v51 = vor.u32 %v2244_v46, %v1883_v45  ;;  %v1675_v52 = vld [vmem:[%s3420_s2 + $0x50] sm:$0xf]  ;;  %v1811_v53 = vld [vmem:[%s3420_s2 + $0x160] sm:$0xf]  ;;  %v2226_v54 = vld [vmem:[%s3420_s2 + $0x164] sm:$0xf0]  ;;  %v1748_v55 = vor.u32 %v2210_v48, %v1747_v47 }
  0x1c   :  { %238 = vmatpush.bf16.msra.mxu0 %v1524_v16  ;;  %v2192_v56 = vld [vmem:[%s3420_s2 + $0x54] sm:$0xf0]  ;;  %v1875_v57 = vld [vmem:[%s3420_s2 + $0x1e0] sm:$0xf]  ;;  %v2242_v58 = vld [vmem:[%s3420_s2 + $0x1e4] sm:$0xf0]  ;;  %v1812_v61 = vor.u32 %v2226_v54, %v1811_v53 }
  0x1d   :  { %252 = vmatpush.bf16.msra.mxu1 %v1528_v19  ;;  %266 = vmatpush.bf16.msra.mxu2 %v1532_v20  ;;  %v1739_v59 = vld [vmem:[%s3420_s2 + $0xd0] sm:$0xf]  ;;  %v2208_v60 = vld [vmem:[%s3420_s2 + $0xd4] sm:$0xf0]  ;;  %v1676_v62 = vor.u32 %v2192_v56, %v1675_v52  ;;  %v1876_v63 = vor.u32 %v2242_v58, %v1875_v57  ;;  %v1667_v0 = vld [vmem:[%s3420_s2 + $0x40] sm:$0xf] }
  0x1e   :  { %280 = vmatpush.bf16.msra.mxu3 %v1536_v24  ;;  %v1803_v1 = vld [vmem:[%s3420_s2 + $0x150] sm:$0xf]  ;;  %v2224_v2 = vld [vmem:[%s3420_s2 + $0x154] sm:$0xf0]  ;;  %v1740_v3 = vor.u32 %v2208_v60, %v1739_v59  ;;  %v2190_v4 = vld [vmem:[%s3420_s2 + $0x44] sm:$0xf0] }
  0x1f   :  { %v1867_v5 = vld [vmem:[%s3420_s2 + $0x1d0] sm:$0xf]  ;;  %v2240_v6 = vld [vmem:[%s3420_s2 + $0x1d4] sm:$0xf0]  ;;  %v1731_v7 = vld [vmem:[%s3420_s2 + $0xc0] sm:$0xf]  ;;  %v1804_v9 = vor.u32 %v2224_v2, %v1803_v1  ;;  %v1668_v10 = vor.u32 %v2190_v4, %v1667_v0 }
  0x20   :  { %239 = vmatpush.bf16.msra.mxu0 %v1508_v31  ;;  %v2206_v8 = vld [vmem:[%s3420_s2 + $0xc4] sm:$0xf0]  ;;  %v1868_v11 = vor.u32 %v2240_v6, %v1867_v5  ;;  %v1659_v12 = vld [vmem:[%s3420_s2 + $0x30] sm:$0xf]  ;;  %v1795_v13 = vld [vmem:[%s3420_s2 + $0x140] sm:$0xf] }
  0x21   :  { %253 = vmatpush.bf16.msra.mxu1 %v1512_v35  ;;  %267 = vmatpush.bf16.msra.mxu2 %v1516_v36  ;;  %v2222_v14 = vld [vmem:[%s3420_s2 + $0x144] sm:$0xf0]  ;;  %v1732_v15 = vor.u32 %v2206_v8, %v1731_v7  ;;  %v2188_v16 = vld [vmem:[%s3420_s2 + $0x34] sm:$0xf0]  ;;  %v1859_v17 = vld [vmem:[%s3420_s2 + $0x1c0] sm:$0xf] }
  0x22   :  { %281 = vmatpush.bf16.msra.mxu3 %v1520_v37  ;;  %v2238_v18 = vld [vmem:[%s3420_s2 + $0x1c4] sm:$0xf0]  ;;  %v1723_v19 = vld [vmem:[%s3420_s2 + $0xb0] sm:$0xf]  ;;  %v2204_v20 = vld [vmem:[%s3420_s2 + $0xb4] sm:$0xf0]  ;;  %v1796_v21 = vor.u32 %v2222_v14, %v1795_v13  ;;  %v1660_v22 = vor.u32 %v2188_v16, %v1659_v12 }
  0x23   :  { %240 = vmatmul.bf16.vlgmr.msra.gmra.mxu0 %v39_v42  ;;  %v1860_v23 = vor.u32 %v2238_v18, %v1859_v17  ;;  %v1651_v24 = vld [vmem:[%s3420_s2 + $0x20] sm:$0xf]  ;;  %v1787_v25 = vld [vmem:[%s3420_s2 + $0x130] sm:$0xf]  ;;  %v2220_v26 = vld [vmem:[%s3420_s2 + $0x134] sm:$0xf0]  ;;  %v1724_v27 = vor.u32 %v2204_v20, %v1723_v19 }
  0x24   :  { %690 = vmatpush.bf16.msrb.mxu0 %v1692_v38  ;;  %254 = vmatmul.bf16.vlgmr.msra.gmra.mxu1 %v39_v42  ;;  %v2186_v28 = vld [vmem:[%s3420_s2 + $0x24] sm:$0xf0]  ;;  %v1851_v29 = vld [vmem:[%s3420_s2 + $0x1b0] sm:$0xf]  ;;  %v2236_v30 = vld [vmem:[%s3420_s2 + $0x1b4] sm:$0xf0]  ;;  %v1788_v33 = vor.u32 %v2220_v26, %v1787_v25 }
  0x25   :  { %704 = vmatpush.bf16.msrb.mxu1 %v1756_v43  ;;  %268 = vmatmul.bf16.vlgmr.msra.gmra.mxu2 %v39_v42  ;;  %v1715_v31 = vld [vmem:[%s3420_s2 + $0xa0] sm:$0xf]  ;;  %v2202_v32 = vld [vmem:[%s3420_s2 + $0xa4] sm:$0xf0]  ;;  %v1652_v34 = vor.u32 %v2186_v28, %v1651_v24  ;;  %v1852_v35 = vor.u32 %v2236_v30, %v1851_v29  ;;  %v1643_v36 = vld [vmem:[%s3420_s2 + $0x10] sm:$0xf] }
  0x26   :  { %282 = vmatmul.bf16.vlgmr.msra.gmra.mxu3 %v39_v42  ;;  %718 = vmatpush.bf16.msrb.mxu2 %v1820_v49  ;;  %v1779_v37 = vld [vmem:[%s3420_s2 + $0x120] sm:$0xf]  ;;  %v2218_v38 = vld [vmem:[%s3420_s2 + $0x124] sm:$0xf0]  ;;  %v1716_v39 = vor.u32 %v2202_v32, %v1715_v31  ;;  %v2184_v40 = vld [vmem:[%s3420_s2 + $0x14] sm:$0xf0] }
  0x27   :  { %732 = vmatpush.bf16.msrb.mxu3 %v1884_v51  ;;  %v1843_v41 = vld [vmem:[%s3420_s2 + $0x1a0] sm:$0xf]  ;;  %v2234_v42 = vld [vmem:[%s3420_s2 + $0x1a4] sm:$0xf0]  ;;  %v1707_v43 = vld [vmem:[%s3420_s2 + $0x90] sm:$0xf]  ;;  %v1780_v45 = vor.u32 %v2218_v38, %v1779_v37  ;;  %v1644_v47 = vor.u32 %v2184_v40, %v1643_v36 }
  0x28   :  { %691 = vmatpush.bf16.msrb.mxu0 %v1684_v50  ;;  %v2200_v44 = vld [vmem:[%s3420_s2 + $0x94] sm:$0xf0]  ;;  %v1635_v46 = vld [vmem:[%s3420_s2] sm:$0xf]  ;;  %v1844_v48 = vor.u32 %v2234_v42, %v1843_v41  ;;  %v2182_v49 = vld [vmem:[%s3420_s2 + $0x4] sm:$0xf0] }
  0x29   :  { %705 = vmatpush.bf16.msrb.mxu1 %v1748_v55  ;;  %v1771_v50 = vld [vmem:[%s3420_s2 + $0x110] sm:$0xf]  ;;  %v2216_v51 = vld [vmem:[%s3420_s2 + $0x114] sm:$0xf0]  ;;  %v1708_v52 = vor.u32 %v2200_v44, %v1707_v43  ;;  %v1699_v53 = vld [vmem:[%s3420_s2 + $0x80] sm:$0xf] }
  0x2a   :  { %719 = vmatpush.bf16.msrb.mxu2 %v1812_v61  ;;  %v1835_v54 = vld [vmem:[%s3420_s2 + $0x190] sm:$0xf]  ;;  %v2232_v55 = vld [vmem:[%s3420_s2 + $0x194] sm:$0xf0]  ;;  %v2198_v56 = vld [vmem:[%s3420_s2 + $0x84] sm:$0xf0]  ;;  %v1772_v61 = vor.u32 %v2216_v51, %v1771_v50 }
  0x2b   :  { %733 = vmatpush.bf16.msrb.mxu3 %v1876_v63  ;;  %v2195_v57 = vld [vmem:[%s3420_s2 + $0x74] sm:$0xf]  ;;  %v1693_v58 = vld [vmem:[%s3420_s2 + $0x78] sm:$0xf0]  ;;  %v1836_v63 = vor.u32 %v2232_v55, %v1835_v54  ;;  %v2193_v0 = vld [vmem:[%s3420_s2 + $0x64] sm:$0xf]  ;;  %v1700_v4 = vor.u32 %v2198_v56, %v1699_v53 }
  0x2c   :  { %692 = vmatpush.bf16.msrb.mxu0 %v1676_v62  ;;  %v2211_v59 = vld [vmem:[%s3420_s2 + $0xf4] sm:$0xf]  ;;  %v1757_v60 = vld [vmem:[%s3420_s2 + $0xf8] sm:$0xf0]  ;;  %v1636_v62 = vor.u32 %v2182_v49, %v1635_v46  ;;  %v1763_v1 = vld [vmem:[%s3420_s2 + $0x100] sm:$0xf]  ;;  %v1696_v5 = vor.u32 %v2195_v57, %v1693_v58 }
  0x2d   :  { %706 = vmatpush.bf16.msrb.mxu1 %v1740_v3  ;;  %v2214_v2 = vld [vmem:[%s3420_s2 + $0x104] sm:$0xf0]  ;;  %v1827_v3 = vld [vmem:[%s3420_s2 + $0x180] sm:$0xf]  ;;  %v2227_v7 = vld [vmem:[%s3420_s2 + $0x174] sm:$0xf] }
  0x2e   :  { %720 = vmatpush.bf16.msrb.mxu2 %v1804_v9  ;;  %v2230_v6 = vld [vmem:[%s3420_s2 + $0x184] sm:$0xf0]  ;;  %v1821_v8 = vld [vmem:[%s3420_s2 + $0x178] sm:$0xf0]  ;;  %v1760_v9 = vor.u32 %v2211_v59, %v1757_v60  ;;  %v2209_v13 = vld [vmem:[%s3420_s2 + $0xe4] sm:$0xf] }
  0x2f   :  { %734 = vmatpush.bf16.msrb.mxu3 %v1868_v11  ;;  %v2243_v11 = vld [vmem:[%s3420_s2 + $0x1f4] sm:$0xf]  ;;  %v1885_v12 = vld [vmem:[%s3420_s2 + $0x1f8] sm:$0xf0]  ;;  %v1749_v14 = vld [vmem:[%s3420_s2 + $0xe8] sm:$0xf0]  ;;  %v1828_v16 = vor.u32 %v2230_v6, %v1827_v3  ;;  %v1824_v17 = vor.u32 %v2227_v7, %v1821_v8 }
  0x30   :  { %693 = vmatpush.bf16.msrb.mxu0 %v1668_v10  ;;  %v1685_v10 = vld [vmem:[%s3420_s2 + $0x68] sm:$0xf0]  ;;  %v1888_v19 = vor.u32 %v2243_v11, %v1885_v12  ;;  %v2191_v20 = vld [vmem:[%s3420_s2 + $0x54] sm:$0xf]  ;;  %v1677_v24 = vld [vmem:[%s3420_s2 + $0x58] sm:$0xf0] }
  0x31   :  { %707 = vmatpush.bf16.msrb.mxu1 %v1732_v15  ;;  %v1764_v15 = vor.u32 %v2214_v2, %v1763_v1  ;;  %v1688_v18 = vor.u32 %v2193_v0, %v1685_v10  ;;  %v2241_v25 = vld [vmem:[%s3420_s2 + $0x1e4] sm:$0xf]  ;;  %v1877_v26 = vld [vmem:[%s3420_s2 + $0x1e8] sm:$0xf0]  ;;  %v1741_v28 = vld [vmem:[%s3420_s2 + $0xd8] sm:$0xf0]  ;;  %v1680_v30 = vor.u32 %v2191_v20, %v1677_v24 }
  0x32   :  { %721 = vmatpush.bf16.msrb.mxu2 %v1796_v21  ;;  %v2225_v21 = vld [vmem:[%s3420_s2 + $0x164] sm:$0xf]  ;;  %v1880_v31 = vor.u32 %v2241_v25, %v1877_v26  ;;  %v1669_v36 = vld [vmem:[%s3420_s2 + $0x48] sm:$0xf0]  ;;  %v2239_v37 = vld [vmem:[%s3420_s2 + $0x1d4] sm:$0xf] }
  0x33   :  { %735 = vmatpush.bf16.msrb.mxu3 %v1860_v23  ;;  %v1752_v23 = vor.u32 %v2209_v13, %v1749_v14  ;;  %v2189_v32 = vld [vmem:[%s3420_s2 + $0x44] sm:$0xf]  ;;  %v1869_v38 = vld [vmem:[%s3420_s2 + $0x1d8] sm:$0xf0]  ;;  %v1733_v40 = vld [vmem:[%s3420_s2 + $0xc8] sm:$0xf0] }
  0x34   :  { %694 = vmatpush.bf16.msrb.mxu0 %v1660_v22  ;;  %v1813_v22 = vld [vmem:[%s3420_s2 + $0x168] sm:$0xf0]  ;;  %v1672_v42 = vor.u32 %v2189_v32, %v1669_v36  ;;  %v1872_v43 = vor.u32 %v2239_v37, %v1869_v38  ;;  %v1661_v46 = vld [vmem:[%s3420_s2 + $0x38] sm:$0xf0]  ;;  %v2221_v51 = vld [vmem:[%s3420_s2 + $0x144] sm:$0xf] }
  0x35   :  { %708 = vmatpush.bf16.msrb.mxu1 %v1724_v27  ;;  %v2207_v27 = vld [vmem:[%s3420_s2 + $0xd4] sm:$0xf]  ;;  %v1816_v29 = vor.u32 %v2225_v21, %v1813_v22  ;;  %v1725_v49 = vld [vmem:[%s3420_s2 + $0xb8] sm:$0xf0]  ;;  %v2237_v53 = vld [vmem:[%s3420_s2 + $0x1c4] sm:$0xf] }
  0x36   :  { %722 = vmatpush.bf16.msrb.mxu2 %v1788_v33  ;;  %v2223_v33 = vld [vmem:[%s3420_s2 + $0x154] sm:$0xf]  ;;  %v1861_v55 = vld [vmem:[%s3420_s2 + $0x1c8] sm:$0xf0]  ;;  %v2185_v56 = vld [vmem:[%s3420_s2 + $0x24] sm:$0xf] }
  0x37   :  { %736 = vmatpush.bf16.msrb.mxu3 %v1852_v35  ;;  %v1744_v35 = vor.u32 %v2207_v27, %v1741_v28  ;;  %v1653_v57 = vld [vmem:[%s3420_s2 + $0x28] sm:$0xf0]  ;;  %v1864_v58 = vor.u32 %v2237_v53, %v1861_v55  ;;  %v2201_v60 = vld [vmem:[%s3420_s2 + $0xa4] sm:$0xf]  ;;  %v1789_v0 = vld [vmem:[%s3420_s2 + $0x138] sm:$0xf0] }
  0x38   :  { %695 = vmatpush.bf16.msrb.mxu0 %v1652_v34  ;;  %v1805_v34 = vld [vmem:[%s3420_s2 + $0x158] sm:$0xf0]  ;;  %v1656_v59 = vor.u32 %v2185_v56, %v1653_v57  ;;  %v2235_v1 = vld [vmem:[%s3420_s2 + $0x1b4] sm:$0xf]  ;;  %v2217_v11 = vld [vmem:[%s3420_s2 + $0x124] sm:$0xf] }
  0x39   :  { %709 = vmatpush.bf16.msrb.mxu1 %v1716_v39  ;;  %v2205_v39 = vld [vmem:[%s3420_s2 + $0xc4] sm:$0xf]  ;;  %v1808_v41 = vor.u32 %v2223_v33, %v1805_v34  ;;  %v1853_v3 = vld [vmem:[%s3420_s2 + $0x1b8] sm:$0xf0]  ;;  %v2199_v7 = vld [vmem:[%s3420_s2 + $0x94] sm:$0xf] }
  0x3a   :  { %723 = vmatpush.bf16.msrb.mxu2 %v1780_v45  ;;  %v1736_v44 = vor.u32 %v2205_v39, %v1733_v40  ;;  %v2187_v45 = vld [vmem:[%s3420_s2 + $0x34] sm:$0xf]  ;;  %v1645_v6 = vld [vmem:[%s3420_s2 + $0x18] sm:$0xf0]  ;;  %v1781_v12 = vld [vmem:[%s3420_s2 + $0x128] sm:$0xf0] }
  0x3b   :  { %737 = vmatpush.bf16.msrb.mxu3 %v1844_v48  ;;  %v1664_v48 = vor.u32 %v2187_v45, %v1661_v46  ;;  %v2233_v13 = vld [vmem:[%s3420_s2 + $0x1a4] sm:$0xf]  ;;  %v1784_v14 = vor.u32 %v2217_v11, %v1781_v12  ;;  %v1701_v21 = vld [vmem:[%s3420_s2 + $0x88] sm:$0xf0]  ;;  %v1773_v24 = vld [vmem:[%s3420_s2 + $0x118] sm:$0xf0] }
  0x3c   :  { %696 = vmatpush.bf16.msrb.mxu0 %v1644_v47  ;;  %v2203_v47 = vld [vmem:[%s3420_s2 + $0xb4] sm:$0xf]  ;;  %v1837_v26 = vld [vmem:[%s3420_s2 + $0x198] sm:$0xf0]  ;;  %v2229_v32 = vld [vmem:[%s3420_s2 + $0x184] sm:$0xf] }
  0x3d   :  { %710 = vmatpush.bf16.msrb.mxu1 %v1708_v52  ;;  %v1728_v50 = vor.u32 %v2203_v47, %v1725_v49  ;;  %v1797_v52 = vld [vmem:[%s3420_s2 + $0x148] sm:$0xf0]  ;;  %v2231_v25 = vld [vmem:[%s3420_s2 + $0x194] sm:$0xf]  ;;  %v1947_v39 = vld [vmem:[%s3421_s4 + $0x70] sm:$0xf] }
  0x3e   :  { %724 = vmatpush.bf16.msrb.mxu2 %v1772_v61  ;;  %v1800_v54 = vor.u32 %v2221_v51, %v1797_v52  ;;  %v1717_v61 = vld [vmem:[%s3420_s2 + $0xa8] sm:$0xf0]  ;;  %v1840_v28 = vor.u32 %v2231_v25, %v1837_v26  ;;  %v2260_v40 = vld [vmem:[%s3421_s4 + $0x74] sm:$0xf0]  ;;  %v1939_v52 = vld [vmem:[%s3421_s4 + $0x60] sm:$0xf] }
  0x3f   :  { %738 = vmatpush.bf16.msrb.mxu3 %v1836_v63  ;;  %v2219_v63 = vld [vmem:[%s3420_s2 + $0x134] sm:$0xf]  ;;  %v1829_v33 = vld [vmem:[%s3420_s2 + $0x188] sm:$0xf0]  ;;  %v2276_v45 = vld [vmem:[%s3421_s4 + $0xf4] sm:$0xf0]  ;;  %v1948_v49 = vor.u32 %v2260_v40, %v1947_v39 }
  0x40   :  { %697 = vmatpush.bf16.msrb.mxu0 %v1636_v62  ;;  %v1720_v62 = vor.u32 %v2201_v60, %v1717_v61  ;;  %v1792_v2 = vor.u32 %v2219_v63, %v1789_v0  ;;  %v1832_v34 = vor.u32 %v2229_v32, %v1829_v33  ;;  %v2258_v53 = vld [vmem:[%s3421_s4 + $0x64] sm:$0xf0]  ;;  %v2003_v55 = vld [vmem:[%s3421_s4 + $0xe0] sm:$0xf]  ;;  %v2139_v60 = vld [vmem:[%s3421_s4 + $0x1f0] sm:$0xf] }
  0x41   :  { %711 = vmatpush.bf16.msrb.mxu1 %v1700_v4  ;;  %v1856_v4 = vor.u32 %v2235_v1, %v1853_v3  ;;  %v2274_v56 = vld [vmem:[%s3421_s4 + $0xe4] sm:$0xf0]  ;;  %v1940_v57 = vor.u32 %v2258_v53, %v1939_v52  ;;  %v2308_v63 = vld [vmem:[%s3421_s4 + $0x1f4] sm:$0xf0]  ;;  %v1931_v0 = vld [vmem:[%s3421_s4 + $0x50] sm:$0xf] }
  0x42   :  { %725 = vmatpush.bf16.msrb.mxu2 %v1764_v15  ;;  %v1845_v15 = vld [vmem:[%s3420_s2 + $0x1a8] sm:$0xf0]  ;;  %v2256_v1 = vld [vmem:[%s3421_s4 + $0x54] sm:$0xf0]  ;;  %v2140_v11 = vor.u32 %v2308_v63, %v2139_v60  ;;  %v2059_v26 = vld [vmem:[%s3421_s4 + $0x150] sm:$0xf] }
  0x43   :  { %739 = vmatpush.bf16.msrb.mxu3 %v1828_v16  ;;  %v1848_v16 = vor.u32 %v2233_v13, %v1845_v15  ;;  %v1932_v12 = vor.u32 %v2256_v1, %v1931_v0  ;;  %v2067_v13 = vld [vmem:[%s3421_s4 + $0x160] sm:$0xf]  ;;  %v2252_v32 = vld [vmem:[%s3421_s4 + $0x34] sm:$0xf0]  ;;  %v1979_v33 = vld [vmem:[%s3421_s4 + $0xb0] sm:$0xf] }
  0x44   :  { %746 = vmatpush.bf16.msra.mxu0 %v1696_v5  ;;  %v2183_v5 = vld [vmem:[%s3420_s2 + $0x14] sm:$0xf]  ;;  %v2131_v15 = vld [vmem:[%s3421_s4 + $0x1e0] sm:$0xf]  ;;  %v2264_v60 = vld [vmem:[%s3421_s4 + $0x94] sm:$0xf0] }
  0x45   :  { %760 = vmatpush.bf16.msra.mxu1 %v1760_v9  ;;  %v1648_v8 = vor.u32 %v2183_v5, %v1645_v6  ;;  %v1709_v9 = vld [vmem:[%s3420_s2 + $0x98] sm:$0xf0]  ;;  %v1995_v5 = vld [vmem:[%s3421_s4 + $0xd0] sm:$0xf]  ;;  %v2272_v6 = vld [vmem:[%s3421_s4 + $0xd4] sm:$0xf0] }
  0x46   :  { %774 = vmatpush.bf16.msra.mxu2 %v1824_v17  ;;  %v1712_v10 = vor.u32 %v2199_v7, %v1709_v9  ;;  %v2181_v17 = vld [vmem:[%s3420_s2 + $0x4] sm:$0xf]  ;;  %v2035_v63 = vld [vmem:[%s3421_s4 + $0x120] sm:$0xf]  ;;  %v2282_v0 = vld [vmem:[%s3421_s4 + $0x124] sm:$0xf0] }
  0x47   :  { %788 = vmatpush.bf16.msra.mxu3 %v1888_v19  ;;  %v2197_v19 = vld [vmem:[%s3420_s2 + $0x84] sm:$0xf]  ;;  %v2099_v1 = vld [vmem:[%s3421_s4 + $0x1a0] sm:$0xf] }
  0x48   :  { %747 = vmatpush.bf16.msra.mxu0 %v1688_v18  ;;  %v1637_v18 = vld [vmem:[%s3420_s2 + $0x8] sm:$0xf0]  ;;  %v1704_v22 = vor.u32 %v2197_v19, %v1701_v21  ;;  %v1923_v19 = vld [vmem:[%s3421_s4 + $0x40] sm:$0xf] }
  0x49   :  { %761 = vmatpush.bf16.msra.mxu1 %v1752_v23  ;;  %v1640_v20 = vor.u32 %v2181_v17, %v1637_v18  ;;  %v2215_v23 = vld [vmem:[%s3420_s2 + $0x114] sm:$0xf]  ;;  %v1996_v17 = vor.u32 %v2272_v6, %v1995_v5  ;;  %v2306_v18 = vld [vmem:[%s3421_s4 + $0x1e4] sm:$0xf0]  ;;  %v1987_v21 = vld [vmem:[%s3421_s4 + $0xc0] sm:$0xf] }
  0x4a   :  { %775 = vmatpush.bf16.msra.mxu2 %v1816_v29  ;;  %v1776_v27 = vor.u32 %v2215_v23, %v1773_v24  ;;  %v2213_v29 = vld [vmem:[%s3420_s2 + $0x104] sm:$0xf]  ;;  %v2132_v24 = vor.u32 %v2306_v18, %v2131_v15  ;;  %v1891_v5 = vld [vmem:[%s3421_s4] sm:$0xf]  ;;  %v2246_v6 = vld [vmem:[%s3421_s4 + $0x4] sm:$0xf0] }
  0x4b   :  { %789 = vmatpush.bf16.msra.mxu3 %v1880_v31  ;;  %v2280_v18 = vld [vmem:[%s3421_s4 + $0x114] sm:$0xf0] }
  0x4c   :  { %748 = vmatpush.bf16.msra.mxu0 %v1680_v30  ;;  %v1765_v30 = vld [vmem:[%s3420_s2 + $0x108] sm:$0xf0] }
  0x4d   :  { %762 = vmatpush.bf16.msra.mxu1 %v1744_v35  ;;  %v1768_v31 = vor.u32 %v2213_v29, %v1765_v30  ;;  %v2123_v29 = vld [vmem:[%s3421_s4 + $0x1d0] sm:$0xf]  ;;  %v2304_v30 = vld [vmem:[%s3421_s4 + $0x1d4] sm:$0xf0] }
  0x4e   :  { %776 = vmatpush.bf16.msra.mxu2 %v1808_v41 }
  0x4f   :  { %790 = vmatpush.bf16.msra.mxu3 %v1872_v43 }
  0x50   :  { %749 = vmatpush.bf16.msra.mxu0 %v1672_v42 }
  0x51   :  { %763 = vmatpush.bf16.msra.mxu1 %v1736_v44  ;;  %v2011_v44 = vld [vmem:[%s3421_s4 + $0xf0] sm:$0xf] }
  0x52   :  { %777 = vmatpush.bf16.msra.mxu2 %v1800_v54  ;;  %v2012_v51 = vor.u32 %v2276_v45, %v2011_v44  ;;  %v2250_v44 = vld [vmem:[%s3421_s4 + $0x24] sm:$0xf0]  ;;  %v1971_v45 = vld [vmem:[%s3421_s4 + $0xa0] sm:$0xf] }
  0x53   :  { %791 = vmatpush.bf16.msra.mxu3 %v1864_v58  ;;  %v2075_v58 = vld [vmem:[%s3421_s4 + $0x170] sm:$0xf] }
  0x54   :  { %750 = vmatpush.bf16.msra.mxu0 %v1664_v48 }
  0x55   :  { %764 = vmatpush.bf16.msra.mxu1 %v1728_v50 }
  0x56   :  { %778 = vmatpush.bf16.msra.mxu2 %v1792_v2 }
  0x57   :  { %792 = vmatpush.bf16.msra.mxu3 %v1856_v4 }
  0x58   :  { %751 = vmatpush.bf16.msra.mxu0 %v1656_v59  ;;  %v2292_v59 = vld [vmem:[%s3421_s4 + $0x174] sm:$0xf0] }
  0x59   :  { %765 = vmatpush.bf16.msra.mxu1 %v1720_v62  ;;  %v2004_v62 = vor.u32 %v2274_v56, %v2003_v55  ;;  %v2076_v9 = vor.u32 %v2292_v59, %v2075_v58  ;;  %v2107_v55 = vld [vmem:[%s3421_s4 + $0x1b0] sm:$0xf]  ;;  %v2300_v56 = vld [vmem:[%s3421_s4 + $0x1b4] sm:$0xf0] }
  0x5a   :  { %779 = vmatpush.bf16.msra.mxu2 %v1784_v14  ;;  %v2290_v14 = vld [vmem:[%s3421_s4 + $0x164] sm:$0xf0]  ;;  %v2248_v58 = vld [vmem:[%s3421_s4 + $0x14] sm:$0xf0]  ;;  %v1963_v59 = vld [vmem:[%s3421_s4 + $0x90] sm:$0xf] }
  0x5b   :  { %793 = vmatpush.bf16.msra.mxu3 %v1848_v16  ;;  %v2068_v23 = vor.u32 %v2290_v14, %v2067_v13  ;;  %v2275_v13 = vld [vmem:[%s3421_s4 + $0xf4] sm:$0xf]  ;;  %v2013_v14 = vld [vmem:[%s3421_s4 + $0xf8] sm:$0xf0] }
  0x5c   :  { %752 = vmatpush.bf16.msra.mxu0 %v1648_v8 }
  0x5d   :  { %766 = vmatpush.bf16.msra.mxu1 %v1712_v10 }
  0x5e   :  { %780 = vmatpush.bf16.msra.mxu2 %v1776_v27  ;;  %v2288_v27 = vld [vmem:[%s3421_s4 + $0x154] sm:$0xf0] }
  0x5f   :  { %794 = vmatpush.bf16.msra.mxu3 %v1840_v28 }
  0x60   :  { %753 = vmatpush.bf16.msra.mxu0 %v1640_v20  ;;  %v2254_v20 = vld [vmem:[%s3421_s4 + $0x44] sm:$0xf0] }
  0x61   :  { %767 = vmatpush.bf16.msra.mxu1 %v1704_v22  ;;  %v2270_v22 = vld [vmem:[%s3421_s4 + $0xc4] sm:$0xf0]  ;;  %v1924_v25 = vor.u32 %v2254_v20, %v1923_v19  ;;  %v1892_v19 = vor.u32 %v2246_v6, %v1891_v5  ;;  %v2251_v5 = vld [vmem:[%s3421_s4 + $0x34] sm:$0xf]  ;;  %v1917_v6 = vld [vmem:[%s3421_s4 + $0x38] sm:$0xf0] }
  0x62   :  { %781 = vmatpush.bf16.msra.mxu2 %v1768_v31  ;;  %v1988_v28 = vor.u32 %v2270_v22, %v1987_v21  ;;  %v1915_v31 = vld [vmem:[%s3421_s4 + $0x30] sm:$0xf]  ;;  %v2296_v22 = vld [vmem:[%s3421_s4 + $0x194] sm:$0xf0] }
  0x63   :  { %795 = vmatpush.bf16.msra.mxu3 %v1832_v34  ;;  %v2268_v34 = vld [vmem:[%s3421_s4 + $0xb4] sm:$0xf0]  ;;  %v1916_v39 = vor.u32 %v2252_v32, %v1915_v31  ;;  %v2091_v21 = vld [vmem:[%s3421_s4 + $0x190] sm:$0xf]  ;;  %v2019_v31 = vld [vmem:[%s3421_s4 + $0x100] sm:$0xf] }
  0x64   :  { %v1980_v40 = vor.u32 %v2268_v34, %v1979_v33  ;;  %v2278_v32 = vld [vmem:[%s3421_s4 + $0x104] sm:$0xf0]  ;;  %v2083_v33 = vld [vmem:[%s3421_s4 + $0x180] sm:$0xf] }
  0x65   :  { %v2294_v34 = vld [vmem:[%s3421_s4 + $0x184] sm:$0xf0] }
  0xa0   :  { %v241_v35 = vpop.f32.mrf.mxu0 }
  0xa1   :  { %v255_v36 = vpop.f32.mrf.mxu1  ;;  %v288_v37 = vmax.f32 %v241_v35, 0.0  ;;  %v2060_v35 = vor.u32 %v2288_v27, %v2059_v26  ;;  %v1941_v27 = vld [vmem:[%s3421_s4 + $0x68] sm:$0xf0] }
  0xa2   :  { %v289_v41 = vmax.f32 %v255_v36, 0.0  ;;  %v2124_v36 = vor.u32 %v2304_v30, %v2123_v29  ;;  %v2005_v29 = vld [vmem:[%s3421_s4 + $0xe8] sm:$0xf0]  ;;  %v2092_v30 = vor.u32 %v2296_v22, %v2091_v21  ;;  %v2265_v21 = vld [vmem:[%s3421_s4 + $0xa4] sm:$0xf] }
  0xa3   :  { %v1973_v22 = vld [vmem:[%s3421_s4 + $0xa8] sm:$0xf0] }
  0xa8   :  { %v269_v38 = vpop.f32.mrf.mxu2  ;;  %v243_v43 = vpop.f32.mrf.mxu0 }
  0xa9   :  { %v283_v42 = vpop.f32.mrf.mxu3  ;;  %v292_v46 = vmax.f32 %v243_v43, 0.0  ;;  %v257_v47 = vpop.f32.mrf.mxu1  ;;  %v290_v2 = vmax.f32 %v269_v38, 0.0  ;;  %v2286_v38 = vld [vmem:[%s3421_s4 + $0x144] sm:$0xf0]  ;;  %v1907_v43 = vld [vmem:[%s3421_s4 + $0x20] sm:$0xf] }
  0xaa   :  { %v293_v48 = vmax.f32 %v257_v47, 0.0  ;;  %v291_v7 = vmax.f32 %v283_v42, 0.0  ;;  %v2302_v42 = vld [vmem:[%s3421_s4 + $0x1c4] sm:$0xf0]  ;;  %v1908_v52 = vor.u32 %v2250_v44, %v1907_v43  ;;  %v1933_v43 = vld [vmem:[%s3421_s4 + $0x58] sm:$0xf0] }
  0xab   :  { %v2985_v50 = vpack.c.bf16 %v292_v46, %v288_v37  ;;  %v2051_v37 = vld [vmem:[%s3421_s4 + $0x140] sm:$0xf]  ;;  %v2266_v46 = vld [vmem:[%s3421_s4 + $0xa4] sm:$0xf0]  ;;  %v2271_v44 = vld [vmem:[%s3421_s4 + $0xd4] sm:$0xf] }
  0xac   :  { %v2993_v54 = vpack.c.bf16 %v293_v48, %v289_v41  ;;  %v2115_v41 = vld [vmem:[%s3421_s4 + $0x1c0] sm:$0xf]  ;;  %v2052_v47 = vor.u32 %v2286_v38, %v2051_v37  ;;  %v1972_v53 = vor.u32 %v2266_v46, %v1971_v45  ;;  %v1997_v45 = vld [vmem:[%s3421_s4 + $0xd8] sm:$0xf0]  ;;  %v2084_v46 = vor.u32 %v2294_v34, %v2083_v33  ;;  %v2263_v33 = vld [vmem:[%s3421_s4 + $0x94] sm:$0xf] }
  0xad   :  { %698 = vmatmul.bf16.vlgmr.msrb.gmra.mxu0 %v2985_v50  ;;  %v2116_v48 = vor.u32 %v2302_v42, %v2115_v41  ;;  %v2255_v41 = vld [vmem:[%s3421_s4 + $0x54] sm:$0xf]  ;;  %v2020_v42 = vor.u32 %v2278_v32, %v2019_v31  ;;  %v1901_v32 = vld [vmem:[%s3421_s4 + $0x18] sm:$0xf0] }
  0xae   :  { %712 = vmatmul.bf16.vlgmr.msrb.gmra.mxu1 %v2993_v54  ;;  %1196 = vmatpush.bf16.msrb.mxu0 %v1948_v49  ;;  %v2043_v49 = vld [vmem:[%s3421_s4 + $0x130] sm:$0xf]  ;;  %v2247_v31 = vld [vmem:[%s3421_s4 + $0x14] sm:$0xf]  ;;  %v1965_v34 = vld [vmem:[%s3421_s4 + $0x98] sm:$0xf0] }
  0xaf   :  { %1210 = vmatpush.bf16.msrb.mxu1 %v2012_v51  ;;  %v2284_v51 = vld [vmem:[%s3421_s4 + $0x134] sm:$0xf0] }
  0xb0   :  { %v271_v61 = vpop.f32.mrf.mxu2 }
  0xb1   :  { %v294_v3 = vmax.f32 %v271_v61, 0.0  ;;  %v285_v4 = vpop.f32.mrf.mxu3  ;;  %v2044_v61 = vor.u32 %v2284_v51, %v2043_v49  ;;  %v2289_v49 = vld [vmem:[%s3421_s4 + $0x164] sm:$0xf]  ;;  %v2069_v51 = vld [vmem:[%s3421_s4 + $0x168] sm:$0xf0] }
  0xb2   :  { %v295_v8 = vmax.f32 %v285_v4, 0.0  ;;  %1197 = vmatpush.bf16.msrb.mxu0 %v1940_v57  ;;  %v1899_v57 = vld [vmem:[%s3421_s4 + $0x10] sm:$0xf]  ;;  %v2298_v4 = vld [vmem:[%s3421_s4 + $0x1a4] sm:$0xf0] }
  0xb3   :  { %v3027_v10 = vpack.c.bf16 %v294_v3, %v290_v2  ;;  %1211 = vmatpush.bf16.msrb.mxu1 %v2004_v62  ;;  %v2108_v62 = vor.u32 %v2300_v56, %v2107_v55  ;;  %v1900_v2 = vor.u32 %v2248_v58, %v1899_v57  ;;  %v1964_v3 = vor.u32 %v2264_v60, %v1963_v59  ;;  %v2305_v55 = vld [vmem:[%s3421_s4 + $0x1e4] sm:$0xf]  ;;  %v2133_v56 = vld [vmem:[%s3421_s4 + $0x1e8] sm:$0xf0] }
  0xb4   :  { %v3038_v16 = vpack.c.bf16 %v295_v8, %v291_v7  ;;  %v1955_v7 = vld [vmem:[%s3421_s4 + $0x80] sm:$0xf]  ;;  %v2262_v8 = vld [vmem:[%s3421_s4 + $0x84] sm:$0xf0]  ;;  %v2100_v15 = vor.u32 %v2298_v4, %v2099_v1  ;;  %v2253_v57 = vld [vmem:[%s3421_s4 + $0x44] sm:$0xf] }
  0xb5   :  { %726 = vmatmul.bf16.vlgmr.msrb.gmra.mxu2 %v3027_v10  ;;  %v1956_v20 = vor.u32 %v2262_v8, %v1955_v7  ;;  %v1925_v58 = vld [vmem:[%s3421_s4 + $0x48] sm:$0xf0]  ;;  %v2269_v59 = vld [vmem:[%s3421_s4 + $0xc4] sm:$0xf]  ;;  %v2125_v4 = vld [vmem:[%s3421_s4 + $0x1d8] sm:$0xf0] }
  0xb6   :  { %740 = vmatmul.bf16.vlgmr.msrb.gmra.mxu3 %v3038_v16  ;;  %1224 = vmatpush.bf16.msrb.mxu2 %v2076_v9  ;;  %v2259_v9 = vld [vmem:[%s3421_s4 + $0x74] sm:$0xf]  ;;  %v1989_v60 = vld [vmem:[%s3421_s4 + $0xc8] sm:$0xf0]  ;;  %v1928_v1 = vor.u32 %v2253_v57, %v1925_v58  ;;  %v1981_v8 = vld [vmem:[%s3421_s4 + $0xb8] sm:$0xf0] }
  0xb7   :  { %1238 = vmatpush.bf16.msrb.mxu3 %v2140_v11  ;;  %1198 = vmatpush.bf16.msrb.mxu0 %v1932_v12  ;;  %v2036_v11 = vor.u32 %v2282_v0, %v2035_v63  ;;  %v1949_v12 = vld [vmem:[%s3421_s4 + $0x78] sm:$0xf0]  ;;  %v2287_v63 = vld [vmem:[%s3421_s4 + $0x154] sm:$0xf] }
  0xb8   :  { %1212 = vmatpush.bf16.msrb.mxu1 %v1996_v17  ;;  %v2027_v17 = vld [vmem:[%s3421_s4 + $0x110] sm:$0xf]  ;;  %v2061_v0 = vld [vmem:[%s3421_s4 + $0x158] sm:$0xf0]  ;;  %v2267_v7 = vld [vmem:[%s3421_s4 + $0xb4] sm:$0xf] }
  0xb9   :  { %v2028_v26 = vor.u32 %v2280_v18, %v2027_v17  ;;  %v2301_v17 = vld [vmem:[%s3421_s4 + $0x1c4] sm:$0xf]  ;;  %v2117_v18 = vld [vmem:[%s3421_s4 + $0x1c8] sm:$0xf0] }
  0xba   :  { %1225 = vmatpush.bf16.msrb.mxu2 %v2068_v23  ;;  %v1952_v23 = vor.u32 %v2259_v9, %v1949_v12  ;;  %v2064_v9 = vor.u32 %v2287_v63, %v2061_v0  ;;  %v2285_v12 = vld [vmem:[%s3421_s4 + $0x144] sm:$0xf] }
  0xbb   :  { %1239 = vmatpush.bf16.msrb.mxu3 %v2132_v24  ;;  %1199 = vmatpush.bf16.msrb.mxu0 %v1924_v25  ;;  %v2016_v24 = vor.u32 %v2275_v13, %v2013_v14  ;;  %v2257_v25 = vld [vmem:[%s3421_s4 + $0x64] sm:$0xf]  ;;  %v2053_v13 = vld [vmem:[%s3421_s4 + $0x148] sm:$0xf0]  ;;  %v1920_v14 = vor.u32 %v2251_v5, %v1917_v6  ;;  %v364_v5 = vld [vmem:[%s3422_s3] sm:$0x3] }
  0xbc   :  { %1213 = vmatpush.bf16.msrb.mxu1 %v1988_v28  ;;  %v2273_v28 = vld [vmem:[%s3421_s4 + $0xe4] sm:$0xf]  ;;  %v1944_v37 = vor.u32 %v2257_v25, %v1941_v27  ;;  %v2283_v25 = vld [vmem:[%s3421_s4 + $0x134] sm:$0xf] }
  0xbd   :  { %754 = vmatmul.bf16.vlgmr.msra.gmra.mxu0 %v2985_v50  ;;  %v2008_v38 = vor.u32 %v2273_v28, %v2005_v29  ;;  %v1976_v28 = vor.u32 %v2265_v21, %v1973_v22  ;;  %v2299_v29 = vld [vmem:[%s3421_s4 + $0x1b4] sm:$0xf] }
  0xbe   :  { %1226 = vmatpush.bf16.msrb.mxu2 %v2060_v35  ;;  %768 = vmatmul.bf16.vlgmr.msra.gmra.mxu1 %v2993_v54  ;;  %v2291_v35 = vld [vmem:[%s3421_s4 + $0x174] sm:$0xf] }
  0xbf   :  { %1240 = vmatpush.bf16.msrb.mxu3 %v2124_v36  ;;  %1200 = vmatpush.bf16.msrb.mxu0 %v1916_v39  ;;  %v2077_v36 = vld [vmem:[%s3421_s4 + $0x178] sm:$0xf0]  ;;  %v2307_v39 = vld [vmem:[%s3421_s4 + $0x1f4] sm:$0xf] }
  0xc0   :  { %1214 = vmatpush.bf16.msrb.mxu1 %v1980_v40  ;;  %v2141_v40 = vld [vmem:[%s3421_s4 + $0x1f8] sm:$0xf0] }
  0xc2   :  { %1227 = vmatpush.bf16.msrb.mxu2 %v2052_v47  ;;  %v2080_v47 = vor.u32 %v2291_v35, %v2077_v36 }
  0xc3   :  { %1241 = vmatpush.bf16.msrb.mxu3 %v2116_v48  ;;  %1201 = vmatpush.bf16.msrb.mxu0 %v1908_v52  ;;  %v2144_v48 = vor.u32 %v2307_v39, %v2141_v40  ;;  %v1936_v52 = vor.u32 %v2255_v41, %v1933_v43  ;;  %v1904_v39 = vor.u32 %v2247_v31, %v1901_v32  ;;  %v2297_v41 = vld [vmem:[%s3421_s4 + $0x1a4] sm:$0xf] }
  0xc4   :  { %1215 = vmatpush.bf16.msrb.mxu1 %v1972_v53  ;;  %v2000_v53 = vor.u32 %v2271_v44, %v1997_v45  ;;  %v1968_v40 = vor.u32 %v2263_v33, %v1965_v34  ;;  %v2245_v43 = vld [vmem:[%s3421_s4 + $0x4] sm:$0xf]  ;;  %v1893_v44 = vld [vmem:[%s3421_s4 + $0x8] sm:$0xf0] }
  0xc5   :  { %782 = vmatmul.bf16.vlgmr.msra.gmra.mxu2 %v3027_v10  ;;  %v2261_v45 = vld [vmem:[%s3421_s4 + $0x84] sm:$0xf] }
  0xc6   :  { %796 = vmatmul.bf16.vlgmr.msra.gmra.mxu3 %v3038_v16  ;;  %1228 = vmatpush.bf16.msrb.mxu2 %v2044_v61  ;;  %v2072_v61 = vor.u32 %v2289_v49, %v2069_v51  ;;  %v2279_v49 = vld [vmem:[%s3421_s4 + $0x114] sm:$0xf]  ;;  %v2029_v51 = vld [vmem:[%s3421_s4 + $0x118] sm:$0xf0] }
  0xc7   :  { %1242 = vmatpush.bf16.msrb.mxu3 %v2108_v62  ;;  %1202 = vmatpush.bf16.msrb.mxu0 %v1900_v2  ;;  %v2136_v62 = vor.u32 %v2305_v55, %v2133_v56  ;;  %v1992_v2 = vor.u32 %v2269_v59, %v1989_v60  ;;  %v2295_v55 = vld [vmem:[%s3421_s4 + $0x194] sm:$0xf]  ;;  %v2093_v56 = vld [vmem:[%s3421_s4 + $0x198] sm:$0xf0]  ;;  %v2032_v57 = vor.u32 %v2279_v49, %v2029_v51  ;;  %v2277_v59 = vld [vmem:[%s3421_s4 + $0x104] sm:$0xf] }
  0xc8   :  { %1216 = vmatpush.bf16.msrb.mxu1 %v1964_v3  ;;  %v2303_v3 = vld [vmem:[%s3421_s4 + $0x1d4] sm:$0xf]  ;;  %v2096_v58 = vor.u32 %v2295_v55, %v2093_v56  ;;  %v2021_v60 = vld [vmem:[%s3421_s4 + $0x108] sm:$0xf0]  ;;  %v366_v49 = vperm.slane %v364_v5, 0 }
  0xc9   :  { %v2024_v63 = vor.u32 %v2277_v59, %v2021_v60 }
  0xca   :  { %1229 = vmatpush.bf16.msrb.mxu2 %v2036_v11  ;;  %v2128_v11 = vor.u32 %v2303_v3, %v2125_v4 }
  0xcb   :  { %1243 = vmatpush.bf16.msrb.mxu3 %v2100_v15  ;;  %1203 = vmatpush.bf16.msrb.mxu0 %v1892_v19  ;;  %v1984_v15 = vor.u32 %v2267_v7, %v1981_v8  ;;  %v2249_v19 = vld [vmem:[%s3421_s4 + $0x24] sm:$0xf]  ;;  %v367_v7 = vperm.slane %v364_v5, 1 }
  0xcc   :  { %1217 = vmatpush.bf16.msrb.mxu1 %v1956_v20  ;;  %v1909_v20 = vld [vmem:[%s3421_s4 + $0x28] sm:$0xf0] }
  0xcd   :  { %v1912_v27 = vor.u32 %v2249_v19, %v1909_v20 }
  0xce   :  { %1230 = vmatpush.bf16.msrb.mxu2 %v2028_v26  ;;  %1204 = vmatmul.bf16.vlgmr.msrb.gmra.mxu0 %v2985_v50  ;;  %v2045_v26 = vld [vmem:[%s3421_s4 + $0x138] sm:$0xf0] }
  0xcf   :  { %1252 = vmatpush.bf16.msra.mxu0 %v1952_v23  ;;  %1244 = vmatpush.bf16.msrb.mxu3 %v2092_v30  ;;  %v2056_v23 = vor.u32 %v2285_v12, %v2053_v13  ;;  %v2109_v30 = vld [vmem:[%s3421_s4 + $0x1b8] sm:$0xf0]  ;;  %v2048_v35 = vor.u32 %v2283_v25, %v2045_v26 }
  0xd0   :  { %1266 = vmatpush.bf16.msra.mxu1 %v2016_v24  ;;  %v2120_v24 = vor.u32 %v2301_v17, %v2117_v18  ;;  %v2112_v36 = vor.u32 %v2299_v29, %v2109_v30 }
  0xd1   :  { %1218 = vmatmul.bf16.vlgmr.msrb.gmra.mxu1 %v2993_v54 }
  0xd2   :  { %1231 = vmatpush.bf16.msrb.mxu2 %v2020_v42  ;;  %v2101_v42 = vld [vmem:[%s3421_s4 + $0x1a8] sm:$0xf0] }
  0xd3   :  { %1253 = vmatpush.bf16.msra.mxu0 %v1944_v37  ;;  %1245 = vmatpush.bf16.msrb.mxu3 %v2084_v46  ;;  %v2281_v37 = vld [vmem:[%s3421_s4 + $0x124] sm:$0xf]  ;;  %v1957_v46 = vld [vmem:[%s3421_s4 + $0x88] sm:$0xf0] }
  0xd4   :  { %1267 = vmatpush.bf16.msra.mxu1 %v2008_v38  ;;  %v2037_v38 = vld [vmem:[%s3421_s4 + $0x128] sm:$0xf0] }
  0xd5   :  { %1232 = vmatmul.bf16.vlgmr.msrb.gmra.mxu2 %v3027_v10 }
  0xd6   :  { %1280 = vmatpush.bf16.msra.mxu2 %v2080_v47  ;;  %1246 = vmatmul.bf16.vlgmr.msrb.gmra.mxu3 %v3038_v16  ;;  %v2040_v47 = vor.u32 %v2281_v37, %v2037_v38 }
  0xd7   :  { %1294 = vmatpush.bf16.msra.mxu3 %v2144_v48  ;;  %1254 = vmatpush.bf16.msra.mxu0 %v1936_v52  ;;  %v2104_v48 = vor.u32 %v2297_v41, %v2101_v42  ;;  %v1896_v52 = vor.u32 %v2245_v43, %v1893_v44 }
  0xd8   :  { %1268 = vmatpush.bf16.msra.mxu1 %v2000_v53  ;;  %v1960_v53 = vor.u32 %v2261_v45, %v1957_v46 }
  0xda   :  { %1281 = vmatpush.bf16.msra.mxu2 %v2072_v61  ;;  %v2293_v61 = vld [vmem:[%s3421_s4 + $0x184] sm:$0xf] }
  0xdb   :  { %1295 = vmatpush.bf16.msra.mxu3 %v2136_v62  ;;  %1255 = vmatpush.bf16.msra.mxu0 %v1928_v1  ;;  %v2085_v62 = vld [vmem:[%s3421_s4 + $0x188] sm:$0xf0] }
  0xdc   :  { %1269 = vmatpush.bf16.msra.mxu1 %v1992_v2  ;;  %v2088_v0 = vor.u32 %v2293_v61, %v2085_v62 }
  0xde   :  { %1282 = vmatpush.bf16.msra.mxu2 %v2064_v9 }
  0xdf   :  { %1296 = vmatpush.bf16.msra.mxu3 %v2128_v11  ;;  %1256 = vmatpush.bf16.msra.mxu0 %v1920_v14 }
  0xe0   :  { %1270 = vmatpush.bf16.msra.mxu1 %v1984_v15 }
  0xe2   :  { %1283 = vmatpush.bf16.msra.mxu2 %v2056_v23  ;;  %v870_v23 = vld [vmem:[%s3423_s5] sm:$0x3] }
  0xe3   :  { %1297 = vmatpush.bf16.msra.mxu3 %v2120_v24  ;;  %1257 = vmatpush.bf16.msra.mxu0 %v1912_v27  ;;  %v872_v25 = vperm.slane %v870_v23, 0 }
  0xe4   :  { %1271 = vmatpush.bf16.msra.mxu1 %v1976_v28 }
  0xe6   :  { %1284 = vmatpush.bf16.msra.mxu2 %v2048_v35 }
  0xe7   :  { %1298 = vmatpush.bf16.msra.mxu3 %v2112_v36  ;;  %1258 = vmatpush.bf16.msra.mxu0 %v1904_v39 }
  0xe8   :  { %1272 = vmatpush.bf16.msra.mxu1 %v1968_v40 }
  0xea   :  { %1285 = vmatpush.bf16.msra.mxu2 %v2040_v47 }
  0xeb   :  { %1299 = vmatpush.bf16.msra.mxu3 %v2104_v48  ;;  %1259 = vmatpush.bf16.msra.mxu0 %v1896_v52 }
  0xec   :  { %1273 = vmatpush.bf16.msra.mxu1 %v1960_v53  ;;  %v873_v53 = vperm.slane %v870_v23, 1 }
  0xee   :  { %1286 = vmatpush.bf16.msra.mxu2 %v2032_v57  ;;  %1260 = vmatmul.bf16.vlgmr.msra.gmra.mxu0 %v2985_v50 }
  0xef   :  { %1300 = vmatpush.bf16.msra.mxu3 %v2096_v58  ;;  %1274 = vmatmul.bf16.vlgmr.msra.gmra.mxu1 %v2993_v54 }
  0xf2   :  { %1287 = vmatpush.bf16.msra.mxu2 %v2024_v63 }
  0xf3   :  { %1301 = vmatpush.bf16.msra.mxu3 %v2088_v0 }
  0xf5   :  { %1288 = vmatmul.bf16.vlgmr.msra.gmra.mxu2 %v3027_v10 }
  0xf6   :  { %1448 = vmatpush.bf16.xpose.msrb.mxu2 %v2985_v50  ;;  %1302 = vmatmul.bf16.vlgmr.msra.gmra.mxu3 %v3038_v16 }
  0xf7   :  { %1461 = vmatpush.bf16.xpose.msrb.mxu3 %v2993_v54 }
 0x12a   :  { %v699_v1 = vpop.f32.mrf.mxu0 }
 0x12b   :  { %v713_v2 = vpop.f32.mrf.mxu1  ;;  %v700_v52 = vadd.f32 %v699_v1, %v366_v49 }
 0x12d   :  { %v714_v59 = vadd.f32 %v713_v2, %v700_v52 }
 0x132   :  { %v701_v3 = vpop.f32.mrf.mxu0 }
 0x133   :  { %v715_v4 = vpop.f32.mrf.mxu1  ;;  %v702_v55 = vadd.f32 %v701_v3, %v366_v49 }
 0x135   :  { %v716_v63 = vadd.f32 %v715_v4, %v702_v55 }
 0x138   :  { %v727_v6 = vpop.f32.mrf.mxu2 }
 0x139   :  { %v3386_v8 = vpop.f32.mrf.mxu3  ;;  %v728_v0 = vadd.f32 %v727_v6, %v714_v59 }
 0x13a   :  { %v755_v9 = vpop.f32.mrf.mxu0 }
 0x13b   :  { %v756_v50 = vadd.f32 %v755_v9, %v367_v7  ;;  %v769_v11 = vpop.f32.mrf.mxu1  ;;  %v742_v1 = vadd.f32 %v3386_v8, %v728_v0 }
 0x13d   :  { %v770_v54 = vadd.f32 %v769_v11, %v756_v50 }
 0x140   :  { %v729_v12 = vpop.f32.mrf.mxu2 }
 0x141   :  { %v3388_v13 = vpop.f32.mrf.mxu3  ;;  %v730_v9 = vadd.f32 %v729_v12, %v716_v63  ;;  %v1390_v12 = vld [vmem:[%s3424_s6] sm:$0x3] }
 0x142   :  { %v757_v14 = vpop.f32.mrf.mxu0  ;;  %1399 = vst [vmem:[#allocation1] ss:$9 sm:$0xff] %v1390_v12 }
 0x143   :  { %v758_v15 = vadd.f32 %v757_v14, %v367_v7  ;;  %v771_v17 = vpop.f32.mrf.mxu1 }
 0x145   :  { %v772_v18 = vadd.f32 %v771_v17, %v758_v15  ;;  %v744_v17 = vadd.f32 %v3388_v13, %v730_v9 }
 0x148   :  { %v783_v19 = vpop.f32.mrf.mxu2 }
 0x149   :  { %v784_v20 = vadd.f32 %v783_v19, %v770_v54  ;;  %v797_v21 = vpop.f32.mrf.mxu3 }
 0x14b   :  { %v3390_v22 = vadd.f32 %v797_v21, %v784_v20  ;;  %v1205_v24 = vpop.f32.mrf.mxu0 }
 0x14c   :  { %v1206_v30 = vadd.f32 %v1205_v24, %v872_v25 }
 0x14e   :  { %v1219_v31 = vpop.f32.mrf.mxu1 }
 0x14f   :  { %v1220_v32 = vadd.f32 %v1219_v31, %v1206_v30 }
 0x150   :  { %v785_v26 = vpop.f32.mrf.mxu2 }
 0x151   :  { %v786_v27 = vadd.f32 %v785_v26, %v772_v18  ;;  %v799_v28 = vpop.f32.mrf.mxu3 }
 0x153   :  { %v3395_v29 = vadd.f32 %v799_v28, %v786_v27  ;;  %v1207_v33 = vpop.f32.mrf.mxu0 }
 0x154   :  { %v1208_v37 = vadd.f32 %v1207_v33, %v872_v25 }
 0x156   :  { %v1221_v40 = vpop.f32.mrf.mxu1 }
 0x157   :  { %v1222_v41 = vadd.f32 %v1221_v40, %v1208_v37 }
 0x158   :  { %v1233_v34 = vpop.f32.mrf.mxu2 }
 0x159   :  { %v1247_v35 = vpop.f32.mrf.mxu3  ;;  %v1234_v36 = vadd.f32 %v1233_v34, %v1220_v32 }
 0x15b   :  { %v1248_v38 = vadd.f32 %v1247_v35, %v1234_v36 }
 0x15d   :  { %v2145_v39 = vmul.f32 -1.442695, %v1248_v38 }
 0x15f   :  { %2311 = vpow2.f32 %v2145_v39 }
 0x160   :  { %v1235_v42 = vpop.f32.mrf.mxu2 }
 0x161   :  { %v1236_v43 = vadd.f32 %v1235_v42, %v1222_v41  ;;  %v1249_v44 = vpop.f32.mrf.mxu3 }
 0x163   :  { %v1250_v45 = vadd.f32 %v1249_v44, %v1236_v43 }
 0x165   :  { %v2312_v46 = vpop.eup %2311  ;;  %v2147_v47 = vmul.f32 -1.442695, %v1250_v45 }
 0x166   :  { %v1320_v48 = vadd.f32 1.0, %v2312_v46  ;;  %v1400_v46 = vld [vmem:[#allocation1] sm:$0xff] }
 0x167   :  { %2313 = vpow2.f32 %v2147_v47  ;;  %v1401_v47 = vld [vmem:[#allocation1 + $0x9] sm:$0xff] }
 0x168   :  { %2315 = vrcp.f32 %v1320_v48  ;;  %v1333_v4 = vand.u32 2147483647, %v1320_v48  ;;  %v1335_v6 = vand.u32 2147483648, %v1320_v48  ;;  %vm1329_vm1 = vweird.f32 %v1320_v48 }
 0x16a   :  { %v1336_v30 = vor.u32 1.1754944e-38, %v1335_v6  ;;  %vm1334_vm5 = vcmp.eq.f32.partialorder %v1333_v4, 8.507059e+37 }
 0x16b   :  { %v1261_v51 = vpop.f32.mrf.mxu0 }
 0x16c   :  { %v1262_v61 = vadd.f32 %v1261_v51, %v873_v53  ;;  %v1275_v62 = vpop.f32.mrf.mxu1  ;;  %v16_v51 = vstv %s3426_s7 }
 0x16d   :  { %v2314_v56 = vpop.eup %2313  ;;  %17 = vst [vmem:[#allocation2] sm:$0x1] %v16_v51 }
 0x16e   :  { %v2316_v57 = vpop.eup %2315  ;;  %v1322_v58 = vadd.f32 1.0, %v2314_v56  ;;  %v1276_v5 = vadd.f32 %v1275_v62, %v1262_v61 }
 0x16f   :  { %v1325_v60 = vmul.f32 %v2316_v57, %v1320_v48  ;;  %vm1330_vm0 = vweird.f32 %v2316_v57  ;;  %v1430_v48 = vld [vmem:[%s3425_s8] sm:$0xf] }
 0x170   :  { %2317 = vrcp.f32 %v1322_v58  ;;  %vm1331_vm2 = vmor %vm1329_vm1, %vm1330_vm0  ;;  %v1363_v13 = vand.u32 2147483647, %v1322_v58  ;;  %v1365_v25 = vand.u32 2147483648, %v1322_v58  ;;  %vm1359_vm4 = vweird.f32 %v1322_v58  ;;  %1432 = vst [vmem:[#allocation1] ss:$9 sm:$0xff] %v1430_v48 }
 0x171   :  { %v1326_v7 = vsub.f32 1.0, %v1325_v60  ;;  %2319 = vtanh.f32 %v742_v1  ;;  %vm1493_vm0 = vcmask 90112   ;;  %vm1495_vm1 = vcmask 91136  }
 0x172   :  { %2321 = vtanh.f32 %v744_v17  ;;  %v1366_v35 = vor.u32 1.1754944e-38, %v1365_v25  ;;  %vm1364_vm7 = vcmp.eq.f32.partialorder %v1363_v13, 8.507059e+37 }
 0x173   :  { %v1327_v50 = vmul.f32 %v2316_v57, %v1326_v7  ;;  %v1263_v11 = vpop.f32.mrf.mxu0 }
 0x174   :  { %v1264_v2 = vadd.f32 %v1263_v11, %v873_v53  ;;  %v1277_v8 = vpop.f32.mrf.mxu1  ;;  %v2335_v53 = vmov 0  }
 0x175   :  { %v1328_v20 = vadd.f32 %v2316_v57, %v1327_v50  ;;  %2310 = vset.pattern.permute.xlu0 %v2335_v53 }
 0x176   :  { %v2318_v15 = vpop.eup %2317  ;;  %v1278_v24 = vadd.f32 %v1277_v8, %v1264_v2 }
 0x177   :  { %v1355_v18 = vmul.f32 %v2318_v15, %v1322_v58  ;;  %v1332_v27 = vsel %vm1331_vm2, %v2316_v57, %v1328_v20  ;;  %vm1360_vm3 = vweird.f32 %v2318_v15  ;;  %v2320_v36 = vpop.eup %2319  ;;  %v1433_v57 = vld [vmem:[#allocation1] sm:$0xff]  ;;  %v1434_v58 = vld [vmem:[#allocation1 + $0x9] sm:$0xff] }
 0x178   :  { %v1289_v54 = vpop.f32.mrf.mxu2  ;;  %v1337_v34 = vsel %vm1334_vm5, %v1336_v30, %v1332_v27  ;;  %vm1361_vm6 = vmor %vm1359_vm4, %vm1360_vm3  ;;  %v2322_v39 = vpop.eup %2321  ;;  %1449 = vmatmul.bf16.vlgmr.msrb.gmra.mxu2 %v1433_v57  ;;  %1462 = vmatmul.bf16.vlgmr.msrb.gmra.mxu3 %v1434_v58  ;;  %v1436_v12 = vld [vmem:[#allocation1 + $0x1b] sm:$0xff] }
 0x179   :  { %v1290_v14 = vadd.f32 %v1289_v54, %v1276_v5  ;;  %v1303_v3 = vpop.f32.mrf.mxu3  ;;  %v1356_v21 = vsub.f32 1.0, %v1355_v18  ;;  %v1384_v43 = vmul.f32 %v2320_v36, %v1337_v34 }
 0x17b   :  { %v1304_v19 = vadd.f32 %v1303_v3, %v1290_v14  ;;  %v1357_v26 = vmul.f32 %v2318_v15, %v1356_v21 }
 0x17d   :  { %v2146_v23 = vmul.f32 -1.442695, %v1304_v19  ;;  %v1358_v32 = vadd.f32 %v2318_v15, %v1357_v26 }
 0x17f   :  { %2323 = vpow2.f32 %v2146_v23  ;;  %v1362_v38 = vsel %vm1361_vm6, %v2318_v15, %v1358_v32  ;;  %v1435_v15 = vld [vmem:[#allocation1 + $0x12] sm:$0xff] }
 0x180   :  { %v1291_v28 = vpop.f32.mrf.mxu2  ;;  %v1367_v40 = vsel %vm1364_vm7, %v1366_v35, %v1362_v38 }
 0x181   :  { %v1292_v31 = vadd.f32 %v1291_v28, %v1278_v24  ;;  %v1305_v33 = vpop.f32.mrf.mxu3  ;;  %v1386_v44 = vmul.f32 %v2322_v39, %v1367_v40 }
 0x183   :  { %v1306_v37 = vadd.f32 %v1305_v33, %v1292_v31  ;;  %v1388_v49 = vpack.c.bf16 %v1386_v44, %v1384_v43 }
 0x185   :  { %v2324_v41 = vpop.eup %2323  ;;  %v2148_v42 = vmul.f32 -1.442695, %v1306_v37  ;;  %1411 = vmatpush.bf16.xpose.msrb.mxu0 %v1388_v49 }
 0x186   :  { %v1321_v45 = vadd.f32 1.0, %v2324_v41 }
 0x187   :  { %2325 = vpow2.f32 %v2148_v42 }
 0x188   :  { %2327 = vrcp.f32 %v1321_v45  ;;  %v1350_v7 = vand.u32 2147483648, %v1321_v45  ;;  %vm1344_vm9 = vweird.f32 %v1321_v45  ;;  %v1348_v50 = vand.u32 2147483647, %v1321_v45 }
 0x18a   :  { %v1351_v14 = vor.u32 1.1754944e-38, %v1350_v7  ;;  %vm1349_vm13 = vcmp.eq.f32.partialorder %v1348_v50, 8.507059e+37 }
 0x18c   :  { %1412 = vmatmul.bf16.vlgmr.msrb.gmra.mxu0 %v1400_v46 }
 0x18d   :  { %1474 = vmatpush.bf16.xpose.msra.mxu0 %v3027_v10  ;;  %v2326_v52 = vpop.eup %2325  ;;  %v1391_v10 = vld [vmem:[#allocation2] sm:$0x1] }
 0x18e   :  { %v2328_v55 = vpop.eup %2327  ;;  %v1323_v56 = vadd.f32 1.0, %v2326_v52  ;;  %1394 = vperm.xlu0 %2310, %v1391_v10  }
 0x18f   :  { %v1340_v59 = vmul.f32 %v2328_v55, %v1321_v45  ;;  %vm1345_vm8 = vweird.f32 %v2328_v55 }
 0x190   :  { %2329 = vrcp.f32 %v1323_v56  ;;  %vm1346_vm10 = vmor %vm1344_vm9, %vm1345_vm8  ;;  %v1380_v5 = vand.u32 2147483648, %v1323_v56  ;;  %v1378_v1 = vand.u32 2147483647, %v1323_v56  ;;  %vm1374_vm12 = vweird.f32 %v1323_v56 }
 0x191   :  { %v1341_v60 = vsub.f32 1.0, %v1340_v59  ;;  %2331 = vtanh.f32 %v3390_v22 }
 0x192   :  { %2333 = vtanh.f32 %v3395_v29  ;;  %v1381_v2 = vor.u32 1.1754944e-38, %v1380_v5  ;;  %vm1379_vm15 = vcmp.eq.f32.partialorder %v1378_v1, 8.507059e+37 }
 0x193   :  { %v1342_v61 = vmul.f32 %v2328_v55, %v1341_v60 }
 0x195   :  { %v1343_v0 = vadd.f32 %v2328_v55, %v1342_v61 }
 0x196   :  { %v2330_v62 = vpop.eup %2329 }
 0x197   :  { %v1370_v63 = vmul.f32 %v2330_v62, %v1323_v56  ;;  %v1347_v54 = vsel %vm1346_vm10, %v2328_v55, %v1343_v0  ;;  %vm1375_vm11 = vweird.f32 %v2330_v62  ;;  %v2332_v22 = vpop.eup %2331 }
 0x198   :  { %v1352_v17 = vsel %vm1349_vm13, %v1351_v14, %v1347_v54  ;;  %vm1376_vm14 = vmor %vm1374_vm12, %vm1375_vm11  ;;  %v2334_v19 = vpop.eup %2333 }
 0x199   :  { %v1371_v9 = vsub.f32 1.0, %v1370_v63  ;;  %v1385_v29 = vmul.f32 %v2332_v22, %v1352_v17 }
 0x19b   :  { %v1372_v11 = vmul.f32 %v2330_v62, %v1371_v9 }
 0x19c   :  { %1475 = vmatmul.bf16.vlgmr.msra.gmra.mxu0 %v1435_v15 }
 0x19d   :  { %v1373_v3 = vadd.f32 %v2330_v62, %v1372_v11 }
 0x19f   :  { %v1377_v18 = vsel %vm1376_vm14, %v2330_v62, %v1373_v3 }
 0x1a0   :  { %v1382_v20 = vsel %vm1379_vm15, %v1381_v2, %v1377_v18 }
 0x1a1   :  { %v1387_v4 = vmul.f32 %v2334_v19, %v1382_v20 }
 0x1a3   :  { %v1389_v6 = vpack.c.bf16 %v1387_v4, %v1385_v29 }
 0x1a5   :  { %1424 = vmatpush.bf16.xpose.msrb.mxu1 %v1389_v6 }
 0x1ac   :  { %1425 = vmatmul.bf16.vlgmr.msrb.gmra.mxu1 %v1401_v47 }
 0x1ad   :  { %1487 = vmatpush.bf16.xpose.msra.mxu1 %v3038_v16 }
 0x1bc   :  { %1488 = vmatmul.bf16.vlgmr.msra.gmra.mxu1 %v1436_v12 }
 0x1fb   :  { %v1450_v8 = vpop.f32.mrf.mxu2  ;;  %v1463_v23 = vpop.f32.mrf.mxu3 }
 0x1fc   :  { %v1464_v34 = vadd.f32 %v1463_v23, %v1450_v8 }
 0x200   :  { %v1395_v27 = vpop.permute.xlu0 %1394 }
 0x201   :  { %v1397_v28 = vperm.slane %v1395_v27, 0 }
 0x203   :  { %v1452_v13 = vpop.f32.mrf.mxu2  ;;  %v1465_v25 = vpop.f32.mrf.mxu3 }
 0x209   :  { %v1413_v21 = vpop.f32.mrf.mxu0 }
 0x20a   :  { %v1414_v31 = vadd.f32 %v1413_v21, %v1397_v28 }
 0x211   :  { %v1415_v24 = vpop.f32.mrf.mxu0 }
 0x219   :  { %v1476_v26 = vpop.f32.mrf.mxu0 }
 0x21a   :  { %v1477_v35 = vadd.f32 %v1476_v26, %v1464_v34 }
 0x221   :  { %v1478_v30 = vpop.f32.mrf.mxu0 }
 0x229   :  { %v1426_v32 = vpop.f32.mrf.mxu1 }
 0x22a   :  { %v1427_v33 = vadd.f32 %v1426_v32, %v1414_v31 }
 0x22c   :  { %1494 = vst.msk [vmem:[%s3427_s9] sm:$0x1] %vm1493_vm0, %v1427_v33 }
 0x231   :  { %v1428_v16 = vpop.f32.mrf.mxu1 }
 0x239   :  { %v1489_v36 = vpop.f32.mrf.mxu1 }
 0x23a   :  { %v1490_v37 = vadd.f32 %v1489_v36, %v1477_v35 }
 0x23c   :  { %1496 = vst.msk [vmem:[%s3428_s10] sm:$0x3] %vm1495_vm1, %v1490_v37 }
 0x241   :  { %v1491_v38 = vpop.f32.mrf.mxu1 }

// kernel: dtfd_tier1_forward.5
= control target key start
LH: loop header
LB: loop body
LE: loop exit
PB: predicated region body
PF: predicated region fallthrough
CT: control target
= control target key end

     0   :  { %s422_s0 = inlined_call_operand.vmem [shape: f32[6,128], index: 0, kind: input, shape index: {}]   ;;  %s423_s1 = inlined_call_operand.vmem [shape: f32[128,512], index: 1, kind: input, shape index: {}]   ;;  %s424_s2 = inlined_call_operand.hbm [shape: f32[6,512], index: 2, kind: output, shape index: {}]  }
   0x1   :  { %v75_v0 = vld [vmem:[%s423_s1 + $0x1f0] sm:$0xff]  ;;  %v76_v1 = vld [vmem:[%s423_s1 + $0x1f8] sm:$0xff]  ;;  %v73_v6 = vld [vmem:[%s423_s1 + $0x1e0] sm:$0xff] }
   0x2   :  { %v71_v2 = vld [vmem:[%s423_s1 + $0x1d0] sm:$0xff]  ;;  %117 = vmatpush.msra.mxu2 %v75_v0  ;;  %137 = vmatpush.msra.mxu3 %v76_v1  ;;  %v72_v3 = vld [vmem:[%s423_s1 + $0x1d8] sm:$0xff]  ;;  %v74_v7 = vld [vmem:[%s423_s1 + $0x1e8] sm:$0xff] }
   0x3   :  { %v67_v4 = vld [vmem:[%s423_s1 + $0x1b0] sm:$0xff]  ;;  %v68_v5 = vld [vmem:[%s423_s1 + $0x1b8] sm:$0xff]  ;;  %v69_v8 = vld [vmem:[%s423_s1 + $0x1c0] sm:$0xff]  ;;  %77 = vmatpush.msra.mxu0 %v73_v6  ;;  %97 = vmatpush.msra.mxu1 %v74_v7 }
   0x4   :  { %118 = vmatpush.msra.mxu2 %v71_v2  ;;  %138 = vmatpush.msra.mxu3 %v72_v3  ;;  %v70_v9 = vld [vmem:[%s423_s1 + $0x1c8] sm:$0xff]  ;;  %v63_v10 = vld [vmem:[%s423_s1 + $0x190] sm:$0xff]  ;;  %v64_v11 = vld [vmem:[%s423_s1 + $0x198] sm:$0xff] }
   0x5   :  { %v65_v12 = vld [vmem:[%s423_s1 + $0x1a0] sm:$0xff]  ;;  %v66_v13 = vld [vmem:[%s423_s1 + $0x1a8] sm:$0xff]  ;;  %78 = vmatpush.msra.mxu0 %v69_v8  ;;  %98 = vmatpush.msra.mxu1 %v70_v9  ;;  %v59_v14 = vld [vmem:[%s423_s1 + $0x170] sm:$0xff] }
   0x6   :  { %119 = vmatpush.msra.mxu2 %v67_v4  ;;  %139 = vmatpush.msra.mxu3 %v68_v5  ;;  %v60_v15 = vld [vmem:[%s423_s1 + $0x178] sm:$0xff]  ;;  %v61_v16 = vld [vmem:[%s423_s1 + $0x180] sm:$0xff]  ;;  %v62_v17 = vld [vmem:[%s423_s1 + $0x188] sm:$0xff] }
   0x7   :  { %79 = vmatpush.msra.mxu0 %v65_v12  ;;  %99 = vmatpush.msra.mxu1 %v66_v13  ;;  %v55_v18 = vld [vmem:[%s423_s1 + $0x150] sm:$0xff]  ;;  %v56_v19 = vld [vmem:[%s423_s1 + $0x158] sm:$0xff]  ;;  %v57_v20 = vld [vmem:[%s423_s1 + $0x160] sm:$0xff] }
   0x8   :  { %120 = vmatpush.msra.mxu2 %v63_v10  ;;  %140 = vmatpush.msra.mxu3 %v64_v11  ;;  %v58_v21 = vld [vmem:[%s423_s1 + $0x168] sm:$0xff]  ;;  %v51_v22 = vld [vmem:[%s423_s1 + $0x130] sm:$0xff]  ;;  %v52_v23 = vld [vmem:[%s423_s1 + $0x138] sm:$0xff] }
   0x9   :  { %80 = vmatpush.msra.mxu0 %v61_v16  ;;  %100 = vmatpush.msra.mxu1 %v62_v17  ;;  %v53_v24 = vld [vmem:[%s423_s1 + $0x140] sm:$0xff]  ;;  %v54_v25 = vld [vmem:[%s423_s1 + $0x148] sm:$0xff]  ;;  %v47_v26 = vld [vmem:[%s423_s1 + $0x110] sm:$0xff] }
   0xa   :  { %121 = vmatpush.msra.mxu2 %v59_v14  ;;  %141 = vmatpush.msra.mxu3 %v60_v15  ;;  %v48_v27 = vld [vmem:[%s423_s1 + $0x118] sm:$0xff]  ;;  %v49_v28 = vld [vmem:[%s423_s1 + $0x120] sm:$0xff]  ;;  %v50_v29 = vld [vmem:[%s423_s1 + $0x128] sm:$0xff] }
   0xb   :  { %81 = vmatpush.msra.mxu0 %v57_v20  ;;  %101 = vmatpush.msra.mxu1 %v58_v21  ;;  %v43_v30 = vld [vmem:[%s423_s1 + $0xf0] sm:$0xff]  ;;  %v44_v31 = vld [vmem:[%s423_s1 + $0xf8] sm:$0xff]  ;;  %v45_v32 = vld [vmem:[%s423_s1 + $0x100] sm:$0xff] }
   0xc   :  { %122 = vmatpush.msra.mxu2 %v55_v18  ;;  %142 = vmatpush.msra.mxu3 %v56_v19  ;;  %v46_v33 = vld [vmem:[%s423_s1 + $0x108] sm:$0xff]  ;;  %v39_v34 = vld [vmem:[%s423_s1 + $0xd0] sm:$0xff]  ;;  %v40_v35 = vld [vmem:[%s423_s1 + $0xd8] sm:$0xff] }
   0xd   :  { %82 = vmatpush.msra.mxu0 %v53_v24  ;;  %102 = vmatpush.msra.mxu1 %v54_v25  ;;  %v41_v36 = vld [vmem:[%s423_s1 + $0xe0] sm:$0xff]  ;;  %v42_v37 = vld [vmem:[%s423_s1 + $0xe8] sm:$0xff]  ;;  %v35_v38 = vld [vmem:[%s423_s1 + $0xb0] sm:$0xff] }
   0xe   :  { %123 = vmatpush.msra.mxu2 %v51_v22  ;;  %143 = vmatpush.msra.mxu3 %v52_v23  ;;  %v36_v39 = vld [vmem:[%s423_s1 + $0xb8] sm:$0xff]  ;;  %v37_v40 = vld [vmem:[%s423_s1 + $0xc0] sm:$0xff]  ;;  %v38_v41 = vld [vmem:[%s423_s1 + $0xc8] sm:$0xff] }
   0xf   :  { %83 = vmatpush.msra.mxu0 %v49_v28  ;;  %103 = vmatpush.msra.mxu1 %v50_v29  ;;  %v31_v42 = vld [vmem:[%s423_s1 + $0x90] sm:$0xff]  ;;  %v32_v43 = vld [vmem:[%s423_s1 + $0x98] sm:$0xff]  ;;  %v33_v44 = vld [vmem:[%s423_s1 + $0xa0] sm:$0xff] }
  0x10   :  { %124 = vmatpush.msra.mxu2 %v47_v26  ;;  %144 = vmatpush.msra.mxu3 %v48_v27  ;;  %v34_v45 = vld [vmem:[%s423_s1 + $0xa8] sm:$0xff] }
  0x11   :  { %84 = vmatpush.msra.mxu0 %v45_v32  ;;  %104 = vmatpush.msra.mxu1 %v46_v33 }
  0x12   :  { %125 = vmatpush.msra.mxu2 %v43_v30  ;;  %145 = vmatpush.msra.mxu3 %v44_v31 }
  0x13   :  { %85 = vmatpush.msra.mxu0 %v41_v36  ;;  %105 = vmatpush.msra.mxu1 %v42_v37 }
  0x14   :  { %126 = vmatpush.msra.mxu2 %v39_v34  ;;  %146 = vmatpush.msra.mxu3 %v40_v35 }
  0x16   :  { %127 = vmatpush.msra.mxu2 %v35_v38  ;;  %147 = vmatpush.msra.mxu3 %v36_v39 }
  0x17   :  { %7 = vsyncpa [#allocation3], 0  ;;  %86 = vmatpush.msra.mxu0 %v37_v40  ;;  %106 = vmatpush.msra.mxu1 %v38_v41  ;;  %v27_v46 = vld [vmem:[%s423_s1 + $0x70] sm:$0xff]  ;;  %v28_v47 = vld [vmem:[%s423_s1 + $0x78] sm:$0xff]  ;;  %s208_s26 = smov [#allocation2]   ;;  %s172_s30 = sshll.u32 %s424_s2, 4  ;;  %s173_s30 = int_to_ptr.hbm [resolvable:$true] %s172_s30 }
  0x18   :  { %128 = vmatpush.msra.mxu2 %v31_v42  ;;  %148 = vmatpush.msra.mxu3 %v32_v43  ;;  %v29_v48 = vld [vmem:[%s423_s1 + $0x80] sm:$0xff]  ;;  %v30_v49 = vld [vmem:[%s423_s1 + $0x88] sm:$0xff]  ;;  %v23_v50 = vld [vmem:[%s423_s1 + $0x50] sm:$0xff]  ;;  %s170_s27 = sshll.u32 %s208_s26, 4  ;;  %s171_s27 = int_to_ptr.vmem [resolvable:$true] %s170_s27 }
  0x19   :  { %87 = vmatpush.msra.mxu0 %v33_v44  ;;  %107 = vmatpush.msra.mxu1 %v34_v45  ;;  %v24_v51 = vld [vmem:[%s423_s1 + $0x58] sm:$0xff]  ;;  %v25_v52 = vld [vmem:[%s423_s1 + $0x60] sm:$0xff]  ;;  %v26_v53 = vld [vmem:[%s423_s1 + $0x68] sm:$0xff] }
  0x1a   :  { %129 = vmatpush.msra.mxu2 %v27_v46  ;;  %149 = vmatpush.msra.mxu3 %v28_v47  ;;  %v19_v54 = vld [vmem:[%s423_s1 + $0x30] sm:$0xff]  ;;  %v20_v55 = vld [vmem:[%s423_s1 + $0x38] sm:$0xff]  ;;  %v21_v56 = vld [vmem:[%s423_s1 + $0x40] sm:$0xff] }
  0x1b   :  { %88 = vmatpush.msra.mxu0 %v29_v48  ;;  %108 = vmatpush.msra.mxu1 %v30_v49  ;;  %v22_v57 = vld [vmem:[%s423_s1 + $0x48] sm:$0xff]  ;;  %v15_v58 = vld [vmem:[%s423_s1 + $0x10] sm:$0xff]  ;;  %v16_v59 = vld [vmem:[%s423_s1 + $0x18] sm:$0xff] }
  0x1c   :  { %130 = vmatpush.msra.mxu2 %v23_v50  ;;  %150 = vmatpush.msra.mxu3 %v24_v51  ;;  %v12_v60 = vld [vmem:[%s422_s0] sm:$0x3f]  ;;  %v18_v62 = vld [vmem:[%s423_s1 + $0x28] sm:$0xff] }
  0x1d   :  { %89 = vmatpush.msra.mxu0 %v25_v52  ;;  %109 = vmatpush.msra.mxu1 %v26_v53  ;;  %v17_v61 = vld [vmem:[%s423_s1 + $0x20] sm:$0xff]  ;;  %v14_v0 = vld [vmem:[%s423_s1 + $0x8] sm:$0xff] }
  0x1e   :  { %131 = vmatpush.msra.mxu2 %v19_v54  ;;  %151 = vmatpush.msra.mxu3 %v20_v55  ;;  %v13_v63 = vld [vmem:[%s423_s1] sm:$0xff] }
  0x1f   :  { %90 = vmatpush.msra.mxu0 %v21_v56  ;;  %110 = vmatpush.msra.mxu1 %v22_v57 }
  0x20   :  { %132 = vmatpush.msra.mxu2 %v15_v58  ;;  %152 = vmatpush.msra.mxu3 %v16_v59 }
  0x21   :  { %133 = vmatmul.f32.vlgmr.msra.gmra.mxu2 %v12_v60  ;;  %153 = vmatmul.f32.vlgmr.msra.gmra.mxu3 %v12_v60 }
  0x22   :  { %91 = vmatpush.msra.mxu0 %v17_v61  ;;  %111 = vmatpush.msra.mxu1 %v18_v62 }
  0x24   :  { %92 = vmatpush.msra.mxu0 %v13_v63  ;;  %112 = vmatpush.msra.mxu1 %v14_v0 }
  0x25   :  { %93 = vmatmul.f32.vlgmr.msra.gmra.mxu0 %v12_v60  ;;  %113 = vmatmul.f32.vlgmr.msra.gmra.mxu1 %v12_v60 }
  0xa2   :  { %v94_v1 = vpop.f32.mrf.mxu0  ;;  %v114_v2 = vpop.f32.mrf.mxu1 }
  0xa3   :  { %v157_v3 = vmax.f32 %v94_v1, 0.0  ;;  %v158_v4 = vmax.f32 %v114_v2, 0.0 }
  0xa4   :  { %v134_v5 = vpop.f32.mrf.mxu2  ;;  %v154_v6 = vpop.f32.mrf.mxu3 }
  0xa5   :  { %161 = vst [vmem:[#allocation2] sm:$0x3f] %v157_v3  ;;  %v159_v7 = vmax.f32 %v134_v5, 0.0  ;;  %v160_v8 = vmax.f32 %v154_v6, 0.0 }
  0xa6   :  { %162 = vst [vmem:[#allocation2 + $0x8] sm:$0x3f] %v158_v4 }
  0xa7   :  { %163 = vst [vmem:[#allocation2 + $0x10] sm:$0x3f] %v159_v7 }
  0xa8   :  { %164 = vst [vmem:[#allocation2 + $0x18] sm:$0x3f] %v160_v8 }
  0xa9   :  { %175 = dma.vmem_to_hbm [thread:$0]  %s171_s27, 512, %s173_s30, [#allocation3]  }
  0xaa   :  { %206 = dma.done.wait [#allocation3], 512  }
  0xab   :  { %207 = vsyncadd [#allocation3], 4294966784 }
  0xac   :  { %180 = vsyncpa [#allocation3], 1 }

</bundles_post_ra>
